<compile_context>
chip_gen: v7x
topology: tpu7x:2x2x1
jax: 0.10.0
libtpu: 0.0.40
codegen_flags: <defaults>
</compile_context>

<pallas_src>
import functools

import jax
import jax.numpy as jnp
from jax.experimental import pallas as pl
from jax.experimental.pallas import tpu as pltpu

INPUT_SIZE = 5
HIDDEN = 32
LAYERS = 3


# ----------------------------------------------------------------------------
# Pallas kernel: full 3-layer LSTM recurrence (wavefront schedule) + folded
# output affine, all in VMEM/vregs. Shapes are tiny (S=8, Bp=8, H=32) so a
# single un-gridded call with static unrolls is used.
# ----------------------------------------------------------------------------
def _lstm_mlp_kernel(S, Bp, x_ref, w_ref, tail_ref, o_ref):
    H, L = HIDDEN, LAYERS
    prec = jax.lax.Precision.DEFAULT

    # Hoisted layer-0 input projection (+ fused, pre-scaled bias), all steps.
    gates_x0 = (jnp.dot(x_ref[...], w_ref[0][:H, :],
                        preferred_element_type=jnp.float32, precision=prec)
                + tail_ref[0:1, :])                          # (S*Bp, 4H)

    h = [jnp.zeros((Bp, H), jnp.float32) for _ in range(L)]
    c = [jnp.zeros((Bp, H), jnp.float32) for _ in range(L)]
    outs = []

    # Wavefront over (layer, time): stage w advances layer l at t = w - l.
    # Every active (l, t) in a stage reads only previous-stage state, so the
    # up-to-3 per-stage chains are independent and their MXU/EUP round-trips
    # overlap; serial depth is S + L - 1 instead of S * L.
    for w in range(S + L - 1):
        prev_h = list(h)                                     # snapshot (values)
        prev_c = list(c)
        for l in range(L):
            t = w - l
            if not 0 <= t < S:
                continue
            wl = w_ref[l]                                    # (2H, 4H): [wih; whh]
            if l == 0:
                gx = gates_x0[t * Bp:(t + 1) * Bp, :]        # aligned 8-row slice
            else:
                gx = (jnp.dot(prev_h[l - 1], wl[:H, :],
                              preferred_element_type=jnp.float32,
                              precision=prec)
                      + tail_ref[l:l + 1, :])
            gates = gx + jnp.dot(prev_h[l], wl[H:, :],
                                 preferred_element_type=jnp.float32,
                                 precision=prec)             # (Bp, 4H) [i f g o]
            # Single EUP pass: i/f/o columns were pre-scaled by 0.5 host-side,
            # so sigmoid(x) = 0.5*tanh(x/2) + 0.5 falls out of one tanh; the
            # g columns (unscaled) are tanh(x) directly.
            th = jnp.tanh(gates)
            sg = 0.5 * th + 0.5
            c_new = sg[:, H:2 * H] * prev_c[l] + sg[:, :H] * th[:, 2 * H:3 * H]
            h_new = sg[:, 3 * H:] * jnp.tanh(c_new)
            h[l] = h_new
            c[l] = c_new
            if l == L - 1:                                   # last layer: t in order
                outs.append(h_new)

    seq = jnp.concatenate(outs, axis=0)                      # (S*Bp, H)

    # Folded output MLP: Linear->Linear->Linear has no inner nonlinearity, so
    # it is one (H, 1) affine; done as multiply + lane reduce (no N=1 MXU
    # matmul), then ReLU.
    wout = tail_ref[L:L + 1, :H]                             # (1, H)
    bout = tail_ref[L + 1:L + 2, 0:1]                        # (1, 1)
    y = jnp.sum(seq * wout, axis=-1, keepdims=True) + bout   # (S*Bp, 1)
    o_ref[...] = jnp.maximum(y, 0.0)


# ----------------------------------------------------------------------------
# Host-side parameter packing: 2 operands, pre-transposed / pre-scaled layout.
# ----------------------------------------------------------------------------
def pack_params(p):
    H, L = HIDDEN, LAYERS
    # Pre-scale the sigmoid gate columns (i, f, o) by 0.5 (exact in f32).
    scale = jnp.concatenate([jnp.full((H,), 0.5, jnp.float32),
                             jnp.full((H,), 0.5, jnp.float32),
                             jnp.ones((H,), jnp.float32),
                             jnp.full((H,), 0.5, jnp.float32)])
    w_blocks, b_rows = [], []
    for l in range(L):
        w_ih = p["w_ih"][l]                                  # (4H, in_dim)
        wih_t = jnp.zeros((H, 4 * H), jnp.float32).at[:w_ih.shape[1], :].set(w_ih.T)
        whh_t = p["w_hh"][l].T.astype(jnp.float32)           # (H, 4H)
        w_blocks.append(jnp.concatenate([wih_t, whh_t], axis=0) * scale[None, :])
        b_rows.append((p["b_ih"][l] + p["b_hh"][l]).astype(jnp.float32) * scale)
    w_all = jnp.stack(w_blocks)                              # (L, 2H, 4H)

    # Fold the three activation-free Linears into one (H, 1) affine at HIGHEST
    # precision so the fused affine matches the unfused reference.
    hp = jax.lax.Precision.HIGHEST
    wout = jnp.dot(jnp.dot(p["w1"].T, p["w2"].T, precision=hp), p["w3"].T,
                   precision=hp)                             # (H, 1)
    bout = (jnp.dot(jnp.dot(p["b1"][None, :], p["w2"].T, precision=hp)
                    + p["b2"][None, :], p["w3"].T, precision=hp)
            + p["b3"][None, :])                              # (1, 1)

    tail = jnp.zeros((8, 4 * H), jnp.float32)
    tail = tail.at[:L, :].set(jnp.stack(b_rows))             # rows 0..L-1: biases
    tail = tail.at[L, :H].set(wout[:, 0])                    # row L: folded weight
    tail = tail.at[L + 1, :].set(bout[0, 0])                 # row L+1: folded bias
    return w_all, tail


def rnn_forward(x, params):
    """x: (S, B, INPUT_SIZE) float32  ->  (S, B, 1) float32."""
    S, B, _ = x.shape
    Bp = ((B + 7) // 8) * 8                                  # 8-sublane granule
    # Host-side: zero-pad feature 5->32 and batch B->Bp; flatten to a
    # lane/sublane-friendly (S*Bp, H) slab (each timestep = 8 aligned rows).
    x_pad = jnp.zeros((S, Bp, HIDDEN), jnp.float32)
    x_pad = x_pad.at[:, :B, :INPUT_SIZE].set(x.astype(jnp.float32))
    x_flat = x_pad.reshape(S * Bp, HIDDEN)

    w_all, tail = pack_params(params)                        # 2 packed operands

    vmem = pl.BlockSpec(memory_space=pltpu.MemorySpace.VMEM)
    out = pl.pallas_call(
        functools.partial(_lstm_mlp_kernel, S, Bp),
        out_shape=jax.ShapeDtypeStruct((S * Bp, 1), jnp.float32),
        in_specs=[vmem, vmem, vmem],
        out_specs=vmem,
    )(x_flat, w_all, tail)
    return out.reshape(S, Bp, 1)[:, :B, :]


# ----------------------------------------------------------------------------
# Deterministic PyTorch-style parameter construction (raw nn.LSTM / nn.Linear
# layout), used both by the kernel (after packing) and the reference.
# ----------------------------------------------------------------------------
def init_params(key):
    keys = jax.random.split(key, 4 * LAYERS + 6)
    klstm = HIDDEN ** -0.5
    idx = 0
    w_ih, w_hh, b_ih, b_hh = [], [], [], []
    for l in range(LAYERS):
        in_dim = INPUT_SIZE if l == 0 else HIDDEN
        w_ih.append(jax.random.uniform(keys[idx], (4 * HIDDEN, in_dim),
                                       jnp.float32, -klstm, klstm)); idx += 1
        w_hh.append(jax.random.uniform(keys[idx], (4 * HIDDEN, HIDDEN),
                                       jnp.float32, -klstm, klstm)); idx += 1
        b_ih.append(jax.random.uniform(keys[idx], (4 * HIDDEN,),
                                       jnp.float32, -klstm, klstm)); idx += 1
        b_hh.append(jax.random.uniform(keys[idx], (4 * HIDDEN,),
                                       jnp.float32, -klstm, klstm)); idx += 1

    def linear(kw, kb, fan_in, fan_out):
        kk = fan_in ** -0.5
        w = jax.random.uniform(kw, (fan_out, fan_in), jnp.float32, -kk, kk)
        bb = jax.random.uniform(kb, (fan_out,), jnp.float32, -kk, kk)
        return w, bb

    w1, b1 = linear(keys[idx], keys[idx + 1], HIDDEN, HIDDEN); idx += 2
    w2, b2 = linear(keys[idx], keys[idx + 1], HIDDEN, HIDDEN); idx += 2
    w3, b3 = linear(keys[idx], keys[idx + 1], HIDDEN, 1); idx += 2
    return {"w_ih": w_ih, "w_hh": w_hh, "b_ih": b_ih, "b_hh": b_hh,
            "w1": w1, "b1": b1, "w2": w2, "b2": b2, "w3": w3, "b3": b3}


# Pure-JAX reference (faithful, un-fused, un-padded math at HIGHEST precision).
def rnn_reference(x, p):
    hp = jax.lax.Precision.HIGHEST
    S, B, _ = x.shape
    seq = x.astype(jnp.float32)
    for l in range(LAYERS):
        w_ih, w_hh = p["w_ih"][l], p["w_hh"][l]
        bias = p["b_ih"][l] + p["b_hh"][l]
        h = jnp.zeros((B, HIDDEN), jnp.float32)
        c = jnp.zeros((B, HIDDEN), jnp.float32)
        outs = []
        for t in range(S):
            gates = (jnp.dot(seq[t], w_ih.T, precision=hp)
                     + jnp.dot(h, w_hh.T, precision=hp) + bias)
            i = jax.nn.sigmoid(gates[:, :HIDDEN])
            f = jax.nn.sigmoid(gates[:, HIDDEN:2 * HIDDEN])
            g = jnp.tanh(gates[:, 2 * HIDDEN:3 * HIDDEN])
            o = jax.nn.sigmoid(gates[:, 3 * HIDDEN:])
            c = f * c + i * g
            h = o * jnp.tanh(c)
            outs.append(h)
        seq = jnp.stack(outs)
    y = seq.reshape(S * B, HIDDEN)
    y = jnp.dot(y, p["w1"].T, precision=hp) + p["b1"]
    y = jnp.dot(y, p["w2"].T, precision=hp) + p["b2"]
    y = jnp.dot(y, p["w3"].T, precision=hp) + p["b3"]
    return jnp.maximum(y, 0.0).reshape(S, B, 1)


if __name__ == "__main__":
    key = jax.random.PRNGKey(0)
    pkey, xkey = jax.random.split(key)
    params = init_params(pkey)

    SEQ, BATCH = 8, 2
    x = jax.random.normal(xkey, (SEQ, BATCH, INPUT_SIZE), dtype=jnp.float32)

    out = jax.block_until_ready(rnn_forward(x, params))
    ref = rnn_reference(x, params)

    assert out.shape == (SEQ, BATCH, 1), out.shape
    max_err = float(jnp.max(jnp.abs(out - ref)))
    assert max_err < 5e-3, max_err
    print("KERNEL_OK")
</pallas_src>

<mosaic_0001>
module attributes {stable_mosaic.version = 11 : i64} {
  func.func @_lstm_mlp_kernel(%arg0: memref<64x32xf32, #tpu.memory_space<vmem>>, %arg1: memref<3x64x128xf32, #tpu.memory_space<vmem>>, %arg2: memref<8x128xf32, #tpu.memory_space<vmem>>, %arg3: memref<64x1xf32, #tpu.memory_space<vmem>>) attributes {dimension_semantics = [], scalar_prefetch = 0 : i64, scratch_operands = 0 : i64, tpu.core_type = #tpu.core_type<tc>} {
    %c0 = arith.constant 0 : index
    %c0_0 = arith.constant 0 : index
    %0 = vector.load %arg0[%c0, %c0_0] : memref<64x32xf32, #tpu.memory_space<vmem>>, vector<64x32xf32>
    %c0_1 = arith.constant 0 : index
    %c0_2 = arith.constant 0 : index
    %c0_3 = arith.constant 0 : index
    %1 = vector.load %arg1[%c0_1, %c0_2, %c0_3] : memref<3x64x128xf32, #tpu.memory_space<vmem>>, vector<1x64x128xf32>
    %2 = vector.shape_cast %1 : vector<1x64x128xf32> to vector<64x128xf32>
    %3 = vector.extract_strided_slice %2 {offsets = [0, 0], sizes = [32, 128], strides = [1, 1]} : vector<64x128xf32> to vector<32x128xf32>
    %cst = arith.constant dense<0.000000e+00> : vector<64x128xf32>
    %4 = tpu.matmul %0, %3, %cst {dimension_numbers = #tpu.dot_dimension_numbers<[1], [0], [0], [1], [0, 0, 1, 1], [], []>} : vector<64x32xf32>, vector<32x128xf32>, vector<64x128xf32> -> vector<64x128xf32>
    %c0_4 = arith.constant 0 : index
    %c0_5 = arith.constant 0 : index
    %5 = vector.load %arg2[%c0_4, %c0_5] : memref<8x128xf32, #tpu.memory_space<vmem>>, vector<1x128xf32>
    %6 = vector.broadcast %5 : vector<1x128xf32> to vector<64x128xf32>
    %7 = arith.addf %4, %6 : vector<64x128xf32>
    %cst_6 = arith.constant 0.000000e+00 : f32
    %8 = vector.broadcast %cst_6 : f32 to vector<8x32xf32>
    %cst_7 = arith.constant 0.000000e+00 : f32
    %9 = vector.broadcast %cst_7 : f32 to vector<8x32xf32>
    %cst_8 = arith.constant 0.000000e+00 : f32
    %10 = vector.broadcast %cst_8 : f32 to vector<8x32xf32>
    %cst_9 = arith.constant 0.000000e+00 : f32
    %11 = vector.broadcast %cst_9 : f32 to vector<8x32xf32>
    %cst_10 = arith.constant 0.000000e+00 : f32
    %12 = vector.broadcast %cst_10 : f32 to vector<8x32xf32>
    %cst_11 = arith.constant 0.000000e+00 : f32
    %13 = vector.broadcast %cst_11 : f32 to vector<8x32xf32>
    %c0_12 = arith.constant 0 : index
    %c0_13 = arith.constant 0 : index
    %c0_14 = arith.constant 0 : index
    %14 = vector.load %arg1[%c0_12, %c0_13, %c0_14] : memref<3x64x128xf32, #tpu.memory_space<vmem>>, vector<1x64x128xf32>
    %15 = vector.shape_cast %14 : vector<1x64x128xf32> to vector<64x128xf32>
    %16 = vector.extract_strided_slice %7 {offsets = [0, 0], sizes = [8, 128], strides = [1, 1]} : vector<64x128xf32> to vector<8x128xf32>
    %17 = vector.extract_strided_slice %15 {offsets = [32, 0], sizes = [32, 128], strides = [1, 1]} : vector<64x128xf32> to vector<32x128xf32>
    %cst_15 = arith.constant dense<0.000000e+00> : vector<8x128xf32>
    %18 = tpu.matmul %8, %17, %cst_15 {dimension_numbers = #tpu.dot_dimension_numbers<[1], [0], [0], [1], [0, 0, 1, 1], [], []>} : vector<8x32xf32>, vector<32x128xf32>, vector<8x128xf32> -> vector<8x128xf32>
    %19 = arith.addf %16, %18 : vector<8x128xf32>
    %20 = math.tanh %19 : vector<8x128xf32>
    %cst_16 = arith.constant 5.000000e-01 : f32
    %21 = vector.broadcast %cst_16 : f32 to vector<8x128xf32>
    %22 = arith.mulf %21, %20 : vector<8x128xf32>
    %cst_17 = arith.constant 5.000000e-01 : f32
    %23 = vector.broadcast %cst_17 : f32 to vector<8x128xf32>
    %24 = arith.addf %22, %23 : vector<8x128xf32>
    %25 = vector.extract_strided_slice %24 {offsets = [0, 32], sizes = [8, 32], strides = [1, 1]} : vector<8x128xf32> to vector<8x32xf32>
    %26 = arith.mulf %25, %11 : vector<8x32xf32>
    %27 = vector.extract_strided_slice %24 {offsets = [0, 0], sizes = [8, 32], strides = [1, 1]} : vector<8x128xf32> to vector<8x32xf32>
    %28 = vector.extract_strided_slice %20 {offsets = [0, 64], sizes = [8, 32], strides = [1, 1]} : vector<8x128xf32> to vector<8x32xf32>
    %29 = arith.mulf %27, %28 : vector<8x32xf32>
    %30 = arith.addf %26, %29 : vector<8x32xf32>
    %31 = vector.extract_strided_slice %24 {offsets = [0, 96], sizes = [8, 32], strides = [1, 1]} : vector<8x128xf32> to vector<8x32xf32>
    %32 = math.tanh %30 : vector<8x32xf32>
    %33 = arith.mulf %31, %32 : vector<8x32xf32>
    %c0_18 = arith.constant 0 : index
    %c0_19 = arith.constant 0 : index
    %c0_20 = arith.constant 0 : index
    %34 = vector.load %arg1[%c0_18, %c0_19, %c0_20] : memref<3x64x128xf32, #tpu.memory_space<vmem>>, vector<1x64x128xf32>
    %35 = vector.shape_cast %34 : vector<1x64x128xf32> to vector<64x128xf32>
    %36 = vector.extract_strided_slice %7 {offsets = [8, 0], sizes = [8, 128], strides = [1, 1]} : vector<64x128xf32> to vector<8x128xf32>
    %37 = vector.extract_strided_slice %35 {offsets = [32, 0], sizes = [32, 128], strides = [1, 1]} : vector<64x128xf32> to vector<32x128xf32>
    %cst_21 = arith.constant dense<0.000000e+00> : vector<8x128xf32>
    %38 = tpu.matmul %33, %37, %cst_21 {dimension_numbers = #tpu.dot_dimension_numbers<[1], [0], [0], [1], [0, 0, 1, 1], [], []>} : vector<8x32xf32>, vector<32x128xf32>, vector<8x128xf32> -> vector<8x128xf32>
    %39 = arith.addf %36, %38 : vector<8x128xf32>
    %40 = math.tanh %39 : vector<8x128xf32>
    %cst_22 = arith.constant 5.000000e-01 : f32
    %41 = vector.broadcast %cst_22 : f32 to vector<8x128xf32>
    %42 = arith.mulf %41, %40 : vector<8x128xf32>
    %cst_23 = arith.constant 5.000000e-01 : f32
    %43 = vector.broadcast %cst_23 : f32 to vector<8x128xf32>
    %44 = arith.addf %42, %43 : vector<8x128xf32>
    %45 = vector.extract_strided_slice %44 {offsets = [0, 32], sizes = [8, 32], strides = [1, 1]} : vector<8x128xf32> to vector<8x32xf32>
    %46 = arith.mulf %45, %30 : vector<8x32xf32>
    %47 = vector.extract_strided_slice %44 {offsets = [0, 0], sizes = [8, 32], strides = [1, 1]} : vector<8x128xf32> to vector<8x32xf32>
    %48 = vector.extract_strided_slice %40 {offsets = [0, 64], sizes = [8, 32], strides = [1, 1]} : vector<8x128xf32> to vector<8x32xf32>
    %49 = arith.mulf %47, %48 : vector<8x32xf32>
    %50 = arith.addf %46, %49 : vector<8x32xf32>
    %51 = vector.extract_strided_slice %44 {offsets = [0, 96], sizes = [8, 32], strides = [1, 1]} : vector<8x128xf32> to vector<8x32xf32>
    %52 = math.tanh %50 : vector<8x32xf32>
    %53 = arith.mulf %51, %52 : vector<8x32xf32>
    %c1 = arith.constant 1 : index
    %c0_24 = arith.constant 0 : index
    %c0_25 = arith.constant 0 : index
    %54 = vector.load %arg1[%c1, %c0_24, %c0_25] : memref<3x64x128xf32, #tpu.memory_space<vmem>>, vector<1x64x128xf32>
    %55 = vector.shape_cast %54 : vector<1x64x128xf32> to vector<64x128xf32>
    %56 = vector.extract_strided_slice %55 {offsets = [0, 0], sizes = [32, 128], strides = [1, 1]} : vector<64x128xf32> to vector<32x128xf32>
    %cst_26 = arith.constant dense<0.000000e+00> : vector<8x128xf32>
    %57 = tpu.matmul %33, %56, %cst_26 {dimension_numbers = #tpu.dot_dimension_numbers<[1], [0], [0], [1], [0, 0, 1, 1], [], []>} : vector<8x32xf32>, vector<32x128xf32>, vector<8x128xf32> -> vector<8x128xf32>
    %c1_27 = arith.constant 1 : index
    %c0_28 = arith.constant 0 : index
    %58 = vector.load %arg2[%c1_27, %c0_28] : memref<8x128xf32, #tpu.memory_space<vmem>>, vector<1x128xf32>
    %59 = vector.broadcast %58 : vector<1x128xf32> to vector<8x128xf32>
    %60 = arith.addf %57, %59 : vector<8x128xf32>
    %61 = vector.extract_strided_slice %55 {offsets = [32, 0], sizes = [32, 128], strides = [1, 1]} : vector<64x128xf32> to vector<32x128xf32>
    %cst_29 = arith.constant dense<0.000000e+00> : vector<8x128xf32>
    %62 = tpu.matmul %9, %61, %cst_29 {dimension_numbers = #tpu.dot_dimension_numbers<[1], [0], [0], [1], [0, 0, 1, 1], [], []>} : vector<8x32xf32>, vector<32x128xf32>, vector<8x128xf32> -> vector<8x128xf32>
    %63 = arith.addf %60, %62 : vector<8x128xf32>
    %64 = math.tanh %63 : vector<8x128xf32>
    %cst_30 = arith.constant 5.000000e-01 : f32
    %65 = vector.broadcast %cst_30 : f32 to vector<8x128xf32>
    %66 = arith.mulf %65, %64 : vector<8x128xf32>
    %cst_31 = arith.constant 5.000000e-01 : f32
    %67 = vector.broadcast %cst_31 : f32 to vector<8x128xf32>
    %68 = arith.addf %66, %67 : vector<8x128xf32>
    %69 = vector.extract_strided_slice %68 {offsets = [0, 32], sizes = [8, 32], strides = [1, 1]} : vector<8x128xf32> to vector<8x32xf32>
    %70 = arith.mulf %69, %12 : vector<8x32xf32>
    %71 = vector.extract_strided_slice %68 {offsets = [0, 0], sizes = [8, 32], strides = [1, 1]} : vector<8x128xf32> to vector<8x32xf32>
    %72 = vector.extract_strided_slice %64 {offsets = [0, 64], sizes = [8, 32], strides = [1, 1]} : vector<8x128xf32> to vector<8x32xf32>
    %73 = arith.mulf %71, %72 : vector<8x32xf32>
    %74 = arith.addf %70, %73 : vector<8x32xf32>
    %75 = vector.extract_strided_slice %68 {offsets = [0, 96], sizes = [8, 32], strides = [1, 1]} : vector<8x128xf32> to vector<8x32xf32>
    %76 = math.tanh %74 : vector<8x32xf32>
    %77 = arith.mulf %75, %76 : vector<8x32xf32>
    %c0_32 = arith.constant 0 : index
    %c0_33 = arith.constant 0 : index
    %c0_34 = arith.constant 0 : index
    %78 = vector.load %arg1[%c0_32, %c0_33, %c0_34] : memref<3x64x128xf32, #tpu.memory_space<vmem>>, vector<1x64x128xf32>
    %79 = vector.shape_cast %78 : vector<1x64x128xf32> to vector<64x128xf32>
    %80 = vector.extract_strided_slice %7 {offsets = [16, 0], sizes = [8, 128], strides = [1, 1]} : vector<64x128xf32> to vector<8x128xf32>
    %81 = vector.extract_strided_slice %79 {offsets = [32, 0], sizes = [32, 128], strides = [1, 1]} : vector<64x128xf32> to vector<32x128xf32>
    %cst_35 = arith.constant dense<0.000000e+00> : vector<8x128xf32>
    %82 = tpu.matmul %53, %81, %cst_35 {dimension_numbers = #tpu.dot_dimension_numbers<[1], [0], [0], [1], [0, 0, 1, 1], [], []>} : vector<8x32xf32>, vector<32x128xf32>, vector<8x128xf32> -> vector<8x128xf32>
    %83 = arith.addf %80, %82 : vector<8x128xf32>
    %84 = math.tanh %83 : vector<8x128xf32>
    %cst_36 = arith.constant 5.000000e-01 : f32
    %85 = vector.broadcast %cst_36 : f32 to vector<8x128xf32>
    %86 = arith.mulf %85, %84 : vector<8x128xf32>
    %cst_37 = arith.constant 5.000000e-01 : f32
    %87 = vector.broadcast %cst_37 : f32 to vector<8x128xf32>
    %88 = arith.addf %86, %87 : vector<8x128xf32>
    %89 = vector.extract_strided_slice %88 {offsets = [0, 32], sizes = [8, 32], strides = [1, 1]} : vector<8x128xf32> to vector<8x32xf32>
    %90 = arith.mulf %89, %50 : vector<8x32xf32>
    %91 = vector.extract_strided_slice %88 {offsets = [0, 0], sizes = [8, 32], strides = [1, 1]} : vector<8x128xf32> to vector<8x32xf32>
    %92 = vector.extract_strided_slice %84 {offsets = [0, 64], sizes = [8, 32], strides = [1, 1]} : vector<8x128xf32> to vector<8x32xf32>
    %93 = arith.mulf %91, %92 : vector<8x32xf32>
    %94 = arith.addf %90, %93 : vector<8x32xf32>
    %95 = vector.extract_strided_slice %88 {offsets = [0, 96], sizes = [8, 32], strides = [1, 1]} : vector<8x128xf32> to vector<8x32xf32>
    %96 = math.tanh %94 : vector<8x32xf32>
    %97 = arith.mulf %95, %96 : vector<8x32xf32>
    %c1_38 = arith.constant 1 : index
    %c0_39 = arith.constant 0 : index
    %c0_40 = arith.constant 0 : index
    %98 = vector.load %arg1[%c1_38, %c0_39, %c0_40] : memref<3x64x128xf32, #tpu.memory_space<vmem>>, vector<1x64x128xf32>
    %99 = vector.shape_cast %98 : vector<1x64x128xf32> to vector<64x128xf32>
    %100 = vector.extract_strided_slice %99 {offsets = [0, 0], sizes = [32, 128], strides = [1, 1]} : vector<64x128xf32> to vector<32x128xf32>
    %cst_41 = arith.constant dense<0.000000e+00> : vector<8x128xf32>
    %101 = tpu.matmul %53, %100, %cst_41 {dimension_numbers = #tpu.dot_dimension_numbers<[1], [0], [0], [1], [0, 0, 1, 1], [], []>} : vector<8x32xf32>, vector<32x128xf32>, vector<8x128xf32> -> vector<8x128xf32>
    %c1_42 = arith.constant 1 : index
    %c0_43 = arith.constant 0 : index
    %102 = vector.load %arg2[%c1_42, %c0_43] : memref<8x128xf32, #tpu.memory_space<vmem>>, vector<1x128xf32>
    %103 = vector.broadcast %102 : vector<1x128xf32> to vector<8x128xf32>
    %104 = arith.addf %101, %103 : vector<8x128xf32>
    %105 = vector.extract_strided_slice %99 {offsets = [32, 0], sizes = [32, 128], strides = [1, 1]} : vector<64x128xf32> to vector<32x128xf32>
    %cst_44 = arith.constant dense<0.000000e+00> : vector<8x128xf32>
    %106 = tpu.matmul %77, %105, %cst_44 {dimension_numbers = #tpu.dot_dimension_numbers<[1], [0], [0], [1], [0, 0, 1, 1], [], []>} : vector<8x32xf32>, vector<32x128xf32>, vector<8x128xf32> -> vector<8x128xf32>
    %107 = arith.addf %104, %106 : vector<8x128xf32>
    %108 = math.tanh %107 : vector<8x128xf32>
    %cst_45 = arith.constant 5.000000e-01 : f32
    %109 = vector.broadcast %cst_45 : f32 to vector<8x128xf32>
    %110 = arith.mulf %109, %108 : vector<8x128xf32>
    %cst_46 = arith.constant 5.000000e-01 : f32
    %111 = vector.broadcast %cst_46 : f32 to vector<8x128xf32>
    %112 = arith.addf %110, %111 : vector<8x128xf32>
    %113 = vector.extract_strided_slice %112 {offsets = [0, 32], sizes = [8, 32], strides = [1, 1]} : vector<8x128xf32> to vector<8x32xf32>
    %114 = arith.mulf %113, %74 : vector<8x32xf32>
    %115 = vector.extract_strided_slice %112 {offsets = [0, 0], sizes = [8, 32], strides = [1, 1]} : vector<8x128xf32> to vector<8x32xf32>
    %116 = vector.extract_strided_slice %108 {offsets = [0, 64], sizes = [8, 32], strides = [1, 1]} : vector<8x128xf32> to vector<8x32xf32>
    %117 = arith.mulf %115, %116 : vector<8x32xf32>
    %118 = arith.addf %114, %117 : vector<8x32xf32>
    %119 = vector.extract_strided_slice %112 {offsets = [0, 96], sizes = [8, 32], strides = [1, 1]} : vector<8x128xf32> to vector<8x32xf32>
    %120 = math.tanh %118 : vector<8x32xf32>
    %121 = arith.mulf %119, %120 : vector<8x32xf32>
    %c2 = arith.constant 2 : index
    %c0_47 = arith.constant 0 : index
    %c0_48 = arith.constant 0 : index
    %122 = vector.load %arg1[%c2, %c0_47, %c0_48] : memref<3x64x128xf32, #tpu.memory_space<vmem>>, vector<1x64x128xf32>
    %123 = vector.shape_cast %122 : vector<1x64x128xf32> to vector<64x128xf32>
    %124 = vector.extract_strided_slice %123 {offsets = [0, 0], sizes = [32, 128], strides = [1, 1]} : vector<64x128xf32> to vector<32x128xf32>
    %cst_49 = arith.constant dense<0.000000e+00> : vector<8x128xf32>
    %125 = tpu.matmul %77, %124, %cst_49 {dimension_numbers = #tpu.dot_dimension_numbers<[1], [0], [0], [1], [0, 0, 1, 1], [], []>} : vector<8x32xf32>, vector<32x128xf32>, vector<8x128xf32> -> vector<8x128xf32>
    %c2_50 = arith.constant 2 : index
    %c0_51 = arith.constant 0 : index
    %126 = vector.load %arg2[%c2_50, %c0_51] : memref<8x128xf32, #tpu.memory_space<vmem>>, vector<1x128xf32>
    %127 = vector.broadcast %126 : vector<1x128xf32> to vector<8x128xf32>
    %128 = arith.addf %125, %127 : vector<8x128xf32>
    %129 = vector.extract_strided_slice %123 {offsets = [32, 0], sizes = [32, 128], strides = [1, 1]} : vector<64x128xf32> to vector<32x128xf32>
    %cst_52 = arith.constant dense<0.000000e+00> : vector<8x128xf32>
    %130 = tpu.matmul %10, %129, %cst_52 {dimension_numbers = #tpu.dot_dimension_numbers<[1], [0], [0], [1], [0, 0, 1, 1], [], []>} : vector<8x32xf32>, vector<32x128xf32>, vector<8x128xf32> -> vector<8x128xf32>
    %131 = arith.addf %128, %130 : vector<8x128xf32>
    %132 = math.tanh %131 : vector<8x128xf32>
    %cst_53 = arith.constant 5.000000e-01 : f32
    %133 = vector.broadcast %cst_53 : f32 to vector<8x128xf32>
    %134 = arith.mulf %133, %132 : vector<8x128xf32>
    %cst_54 = arith.constant 5.000000e-01 : f32
    %135 = vector.broadcast %cst_54 : f32 to vector<8x128xf32>
    %136 = arith.addf %134, %135 : vector<8x128xf32>
    %137 = vector.extract_strided_slice %136 {offsets = [0, 32], sizes = [8, 32], strides = [1, 1]} : vector<8x128xf32> to vector<8x32xf32>
    %138 = arith.mulf %137, %13 : vector<8x32xf32>
    %139 = vector.extract_strided_slice %136 {offsets = [0, 0], sizes = [8, 32], strides = [1, 1]} : vector<8x128xf32> to vector<8x32xf32>
    %140 = vector.extract_strided_slice %132 {offsets = [0, 64], sizes = [8, 32], strides = [1, 1]} : vector<8x128xf32> to vector<8x32xf32>
    %141 = arith.mulf %139, %140 : vector<8x32xf32>
    %142 = arith.addf %138, %141 : vector<8x32xf32>
    %143 = vector.extract_strided_slice %136 {offsets = [0, 96], sizes = [8, 32], strides = [1, 1]} : vector<8x128xf32> to vector<8x32xf32>
    %144 = math.tanh %142 : vector<8x32xf32>
    %145 = arith.mulf %143, %144 : vector<8x32xf32>
    %c0_55 = arith.constant 0 : index
    %c0_56 = arith.constant 0 : index
    %c0_57 = arith.constant 0 : index
    %146 = vector.load %arg1[%c0_55, %c0_56, %c0_57] : memref<3x64x128xf32, #tpu.memory_space<vmem>>, vector<1x64x128xf32>
    %147 = vector.shape_cast %146 : vector<1x64x128xf32> to vector<64x128xf32>
    %148 = vector.extract_strided_slice %7 {offsets = [24, 0], sizes = [8, 128], strides = [1, 1]} : vector<64x128xf32> to vector<8x128xf32>
    %149 = vector.extract_strided_slice %147 {offsets = [32, 0], sizes = [32, 128], strides = [1, 1]} : vector<64x128xf32> to vector<32x128xf32>
    %cst_58 = arith.constant dense<0.000000e+00> : vector<8x128xf32>
    %150 = tpu.matmul %97, %149, %cst_58 {dimension_numbers = #tpu.dot_dimension_numbers<[1], [0], [0], [1], [0, 0, 1, 1], [], []>} : vector<8x32xf32>, vector<32x128xf32>, vector<8x128xf32> -> vector<8x128xf32>
    %151 = arith.addf %148, %150 : vector<8x128xf32>
    %152 = math.tanh %151 : vector<8x128xf32>
    %cst_59 = arith.constant 5.000000e-01 : f32
    %153 = vector.broadcast %cst_59 : f32 to vector<8x128xf32>
    %154 = arith.mulf %153, %152 : vector<8x128xf32>
    %cst_60 = arith.constant 5.000000e-01 : f32
    %155 = vector.broadcast %cst_60 : f32 to vector<8x128xf32>
    %156 = arith.addf %154, %155 : vector<8x128xf32>
    %157 = vector.extract_strided_slice %156 {offsets = [0, 32], sizes = [8, 32], strides = [1, 1]} : vector<8x128xf32> to vector<8x32xf32>
    %158 = arith.mulf %157, %94 : vector<8x32xf32>
    %159 = vector.extract_strided_slice %156 {offsets = [0, 0], sizes = [8, 32], strides = [1, 1]} : vector<8x128xf32> to vector<8x32xf32>
    %160 = vector.extract_strided_slice %152 {offsets = [0, 64], sizes = [8, 32], strides = [1, 1]} : vector<8x128xf32> to vector<8x32xf32>
    %161 = arith.mulf %159, %160 : vector<8x32xf32>
    %162 = arith.addf %158, %161 : vector<8x32xf32>
    %163 = vector.extract_strided_slice %156 {offsets = [0, 96], sizes = [8, 32], strides = [1, 1]} : vector<8x128xf32> to vector<8x32xf32>
    %164 = math.tanh %162 : vector<8x32xf32>
    %165 = arith.mulf %163, %164 : vector<8x32xf32>
    %c1_61 = arith.constant 1 : index
    %c0_62 = arith.constant 0 : index
    %c0_63 = arith.constant 0 : index
    %166 = vector.load %arg1[%c1_61, %c0_62, %c0_63] : memref<3x64x128xf32, #tpu.memory_space<vmem>>, vector<1x64x128xf32>
    %167 = vector.shape_cast %166 : vector<1x64x128xf32> to vector<64x128xf32>
    %168 = vector.extract_strided_slice %167 {offsets = [0, 0], sizes = [32, 128], strides = [1, 1]} : vector<64x128xf32> to vector<32x128xf32>
    %cst_64 = arith.constant dense<0.000000e+00> : vector<8x128xf32>
    %169 = tpu.matmul %97, %168, %cst_64 {dimension_numbers = #tpu.dot_dimension_numbers<[1], [0], [0], [1], [0, 0, 1, 1], [], []>} : vector<8x32xf32>, vector<32x128xf32>, vector<8x128xf32> -> vector<8x128xf32>
    %c1_65 = arith.constant 1 : index
    %c0_66 = arith.constant 0 : index
    %170 = vector.load %arg2[%c1_65, %c0_66] : memref<8x128xf32, #tpu.memory_space<vmem>>, vector<1x128xf32>
    %171 = vector.broadcast %170 : vector<1x128xf32> to vector<8x128xf32>
    %172 = arith.addf %169, %171 : vector<8x128xf32>
    %173 = vector.extract_strided_slice %167 {offsets = [32, 0], sizes = [32, 128], strides = [1, 1]} : vector<64x128xf32> to vector<32x128xf32>
    %cst_67 = arith.constant dense<0.000000e+00> : vector<8x128xf32>
    %174 = tpu.matmul %121, %173, %cst_67 {dimension_numbers = #tpu.dot_dimension_numbers<[1], [0], [0], [1], [0, 0, 1, 1], [], []>} : vector<8x32xf32>, vector<32x128xf32>, vector<8x128xf32> -> vector<8x128xf32>
    %175 = arith.addf %172, %174 : vector<8x128xf32>
    %176 = math.tanh %175 : vector<8x128xf32>
    %cst_68 = arith.constant 5.000000e-01 : f32
    %177 = vector.broadcast %cst_68 : f32 to vector<8x128xf32>
    %178 = arith.mulf %177, %176 : vector<8x128xf32>
    %cst_69 = arith.constant 5.000000e-01 : f32
    %179 = vector.broadcast %cst_69 : f32 to vector<8x128xf32>
    %180 = arith.addf %178, %179 : vector<8x128xf32>
    %181 = vector.extract_strided_slice %180 {offsets = [0, 32], sizes = [8, 32], strides = [1, 1]} : vector<8x128xf32> to vector<8x32xf32>
    %182 = arith.mulf %181, %118 : vector<8x32xf32>
    %183 = vector.extract_strided_slice %180 {offsets = [0, 0], sizes = [8, 32], strides = [1, 1]} : vector<8x128xf32> to vector<8x32xf32>
    %184 = vector.extract_strided_slice %176 {offsets = [0, 64], sizes = [8, 32], strides = [1, 1]} : vector<8x128xf32> to vector<8x32xf32>
    %185 = arith.mulf %183, %184 : vector<8x32xf32>
    %186 = arith.addf %182, %185 : vector<8x32xf32>
    %187 = vector.extract_strided_slice %180 {offsets = [0, 96], sizes = [8, 32], strides = [1, 1]} : vector<8x128xf32> to vector<8x32xf32>
    %188 = math.tanh %186 : vector<8x32xf32>
    %189 = arith.mulf %187, %188 : vector<8x32xf32>
    %c2_70 = arith.constant 2 : index
    %c0_71 = arith.constant 0 : index
    %c0_72 = arith.constant 0 : index
    %190 = vector.load %arg1[%c2_70, %c0_71, %c0_72] : memref<3x64x128xf32, #tpu.memory_space<vmem>>, vector<1x64x128xf32>
    %191 = vector.shape_cast %190 : vector<1x64x128xf32> to vector<64x128xf32>
    %192 = vector.extract_strided_slice %191 {offsets = [0, 0], sizes = [32, 128], strides = [1, 1]} : vector<64x128xf32> to vector<32x128xf32>
    %cst_73 = arith.constant dense<0.000000e+00> : vector<8x128xf32>
    %193 = tpu.matmul %121, %192, %cst_73 {dimension_numbers = #tpu.dot_dimension_numbers<[1], [0], [0], [1], [0, 0, 1, 1], [], []>} : vector<8x32xf32>, vector<32x128xf32>, vector<8x128xf32> -> vector<8x128xf32>
    %c2_74 = arith.constant 2 : index
    %c0_75 = arith.constant 0 : index
    %194 = vector.load %arg2[%c2_74, %c0_75] : memref<8x128xf32, #tpu.memory_space<vmem>>, vector<1x128xf32>
    %195 = vector.broadcast %194 : vector<1x128xf32> to vector<8x128xf32>
    %196 = arith.addf %193, %195 : vector<8x128xf32>
    %197 = vector.extract_strided_slice %191 {offsets = [32, 0], sizes = [32, 128], strides = [1, 1]} : vector<64x128xf32> to vector<32x128xf32>
    %cst_76 = arith.constant dense<0.000000e+00> : vector<8x128xf32>
    %198 = tpu.matmul %145, %197, %cst_76 {dimension_numbers = #tpu.dot_dimension_numbers<[1], [0], [0], [1], [0, 0, 1, 1], [], []>} : vector<8x32xf32>, vector<32x128xf32>, vector<8x128xf32> -> vector<8x128xf32>
    %199 = arith.addf %196, %198 : vector<8x128xf32>
    %200 = math.tanh %199 : vector<8x128xf32>
    %cst_77 = arith.constant 5.000000e-01 : f32
    %201 = vector.broadcast %cst_77 : f32 to vector<8x128xf32>
    %202 = arith.mulf %201, %200 : vector<8x128xf32>
    %cst_78 = arith.constant 5.000000e-01 : f32
    %203 = vector.broadcast %cst_78 : f32 to vector<8x128xf32>
    %204 = arith.addf %202, %203 : vector<8x128xf32>
    %205 = vector.extract_strided_slice %204 {offsets = [0, 32], sizes = [8, 32], strides = [1, 1]} : vector<8x128xf32> to vector<8x32xf32>
    %206 = arith.mulf %205, %142 : vector<8x32xf32>
    %207 = vector.extract_strided_slice %204 {offsets = [0, 0], sizes = [8, 32], strides = [1, 1]} : vector<8x128xf32> to vector<8x32xf32>
    %208 = vector.extract_strided_slice %200 {offsets = [0, 64], sizes = [8, 32], strides = [1, 1]} : vector<8x128xf32> to vector<8x32xf32>
    %209 = arith.mulf %207, %208 : vector<8x32xf32>
    %210 = arith.addf %206, %209 : vector<8x32xf32>
    %211 = vector.extract_strided_slice %204 {offsets = [0, 96], sizes = [8, 32], strides = [1, 1]} : vector<8x128xf32> to vector<8x32xf32>
    %212 = math.tanh %210 : vector<8x32xf32>
    %213 = arith.mulf %211, %212 : vector<8x32xf32>
    %c0_79 = arith.constant 0 : index
    %c0_80 = arith.constant 0 : index
    %c0_81 = arith.constant 0 : index
    %214 = vector.load %arg1[%c0_79, %c0_80, %c0_81] : memref<3x64x128xf32, #tpu.memory_space<vmem>>, vector<1x64x128xf32>
    %215 = vector.shape_cast %214 : vector<1x64x128xf32> to vector<64x128xf32>
    %216 = vector.extract_strided_slice %7 {offsets = [32, 0], sizes = [8, 128], strides = [1, 1]} : vector<64x128xf32> to vector<8x128xf32>
    %217 = vector.extract_strided_slice %215 {offsets = [32, 0], sizes = [32, 128], strides = [1, 1]} : vector<64x128xf32> to vector<32x128xf32>
    %cst_82 = arith.constant dense<0.000000e+00> : vector<8x128xf32>
    %218 = tpu.matmul %165, %217, %cst_82 {dimension_numbers = #tpu.dot_dimension_numbers<[1], [0], [0], [1], [0, 0, 1, 1], [], []>} : vector<8x32xf32>, vector<32x128xf32>, vector<8x128xf32> -> vector<8x128xf32>
    %219 = arith.addf %216, %218 : vector<8x128xf32>
    %220 = math.tanh %219 : vector<8x128xf32>
    %cst_83 = arith.constant 5.000000e-01 : f32
    %221 = vector.broadcast %cst_83 : f32 to vector<8x128xf32>
    %222 = arith.mulf %221, %220 : vector<8x128xf32>
    %cst_84 = arith.constant 5.000000e-01 : f32
    %223 = vector.broadcast %cst_84 : f32 to vector<8x128xf32>
    %224 = arith.addf %222, %223 : vector<8x128xf32>
    %225 = vector.extract_strided_slice %224 {offsets = [0, 32], sizes = [8, 32], strides = [1, 1]} : vector<8x128xf32> to vector<8x32xf32>
    %226 = arith.mulf %225, %162 : vector<8x32xf32>
    %227 = vector.extract_strided_slice %224 {offsets = [0, 0], sizes = [8, 32], strides = [1, 1]} : vector<8x128xf32> to vector<8x32xf32>
    %228 = vector.extract_strided_slice %220 {offsets = [0, 64], sizes = [8, 32], strides = [1, 1]} : vector<8x128xf32> to vector<8x32xf32>
    %229 = arith.mulf %227, %228 : vector<8x32xf32>
    %230 = arith.addf %226, %229 : vector<8x32xf32>
    %231 = vector.extract_strided_slice %224 {offsets = [0, 96], sizes = [8, 32], strides = [1, 1]} : vector<8x128xf32> to vector<8x32xf32>
    %232 = math.tanh %230 : vector<8x32xf32>
    %233 = arith.mulf %231, %232 : vector<8x32xf32>
    %c1_85 = arith.constant 1 : index
    %c0_86 = arith.constant 0 : index
    %c0_87 = arith.constant 0 : index
    %234 = vector.load %arg1[%c1_85, %c0_86, %c0_87] : memref<3x64x128xf32, #tpu.memory_space<vmem>>, vector<1x64x128xf32>
    %235 = vector.shape_cast %234 : vector<1x64x128xf32> to vector<64x128xf32>
    %236 = vector.extract_strided_slice %235 {offsets = [0, 0], sizes = [32, 128], strides = [1, 1]} : vector<64x128xf32> to vector<32x128xf32>
    %cst_88 = arith.constant dense<0.000000e+00> : vector<8x128xf32>
    %237 = tpu.matmul %165, %236, %cst_88 {dimension_numbers = #tpu.dot_dimension_numbers<[1], [0], [0], [1], [0, 0, 1, 1], [], []>} : vector<8x32xf32>, vector<32x128xf32>, vector<8x128xf32> -> vector<8x128xf32>
    %c1_89 = arith.constant 1 : index
    %c0_90 = arith.constant 0 : index
    %238 = vector.load %arg2[%c1_89, %c0_90] : memref<8x128xf32, #tpu.memory_space<vmem>>, vector<1x128xf32>
    %239 = vector.broadcast %238 : vector<1x128xf32> to vector<8x128xf32>
    %240 = arith.addf %237, %239 : vector<8x128xf32>
    %241 = vector.extract_strided_slice %235 {offsets = [32, 0], sizes = [32, 128], strides = [1, 1]} : vector<64x128xf32> to vector<32x128xf32>
    %cst_91 = arith.constant dense<0.000000e+00> : vector<8x128xf32>
    %242 = tpu.matmul %189, %241, %cst_91 {dimension_numbers = #tpu.dot_dimension_numbers<[1], [0], [0], [1], [0, 0, 1, 1], [], []>} : vector<8x32xf32>, vector<32x128xf32>, vector<8x128xf32> -> vector<8x128xf32>
    %243 = arith.addf %240, %242 : vector<8x128xf32>
    %244 = math.tanh %243 : vector<8x128xf32>
    %cst_92 = arith.constant 5.000000e-01 : f32
    %245 = vector.broadcast %cst_92 : f32 to vector<8x128xf32>
    %246 = arith.mulf %245, %244 : vector<8x128xf32>
    %cst_93 = arith.constant 5.000000e-01 : f32
    %247 = vector.broadcast %cst_93 : f32 to vector<8x128xf32>
    %248 = arith.addf %246, %247 : vector<8x128xf32>
    %249 = vector.extract_strided_slice %248 {offsets = [0, 32], sizes = [8, 32], strides = [1, 1]} : vector<8x128xf32> to vector<8x32xf32>
    %250 = arith.mulf %249, %186 : vector<8x32xf32>
    %251 = vector.extract_strided_slice %248 {offsets = [0, 0], sizes = [8, 32], strides = [1, 1]} : vector<8x128xf32> to vector<8x32xf32>
    %252 = vector.extract_strided_slice %244 {offsets = [0, 64], sizes = [8, 32], strides = [1, 1]} : vector<8x128xf32> to vector<8x32xf32>
    %253 = arith.mulf %251, %252 : vector<8x32xf32>
    %254 = arith.addf %250, %253 : vector<8x32xf32>
    %255 = vector.extract_strided_slice %248 {offsets = [0, 96], sizes = [8, 32], strides = [1, 1]} : vector<8x128xf32> to vector<8x32xf32>
    %256 = math.tanh %254 : vector<8x32xf32>
    %257 = arith.mulf %255, %256 : vector<8x32xf32>
    %c2_94 = arith.constant 2 : index
    %c0_95 = arith.constant 0 : index
    %c0_96 = arith.constant 0 : index
    %258 = vector.load %arg1[%c2_94, %c0_95, %c0_96] : memref<3x64x128xf32, #tpu.memory_space<vmem>>, vector<1x64x128xf32>
    %259 = vector.shape_cast %258 : vector<1x64x128xf32> to vector<64x128xf32>
    %260 = vector.extract_strided_slice %259 {offsets = [0, 0], sizes = [32, 128], strides = [1, 1]} : vector<64x128xf32> to vector<32x128xf32>
    %cst_97 = arith.constant dense<0.000000e+00> : vector<8x128xf32>
    %261 = tpu.matmul %189, %260, %cst_97 {dimension_numbers = #tpu.dot_dimension_numbers<[1], [0], [0], [1], [0, 0, 1, 1], [], []>} : vector<8x32xf32>, vector<32x128xf32>, vector<8x128xf32> -> vector<8x128xf32>
    %c2_98 = arith.constant 2 : index
    %c0_99 = arith.constant 0 : index
    %262 = vector.load %arg2[%c2_98, %c0_99] : memref<8x128xf32, #tpu.memory_space<vmem>>, vector<1x128xf32>
    %263 = vector.broadcast %262 : vector<1x128xf32> to vector<8x128xf32>
    %264 = arith.addf %261, %263 : vector<8x128xf32>
    %265 = vector.extract_strided_slice %259 {offsets = [32, 0], sizes = [32, 128], strides = [1, 1]} : vector<64x128xf32> to vector<32x128xf32>
    %cst_100 = arith.constant dense<0.000000e+00> : vector<8x128xf32>
    %266 = tpu.matmul %213, %265, %cst_100 {dimension_numbers = #tpu.dot_dimension_numbers<[1], [0], [0], [1], [0, 0, 1, 1], [], []>} : vector<8x32xf32>, vector<32x128xf32>, vector<8x128xf32> -> vector<8x128xf32>
    %267 = arith.addf %264, %266 : vector<8x128xf32>
    %268 = math.tanh %267 : vector<8x128xf32>
    %cst_101 = arith.constant 5.000000e-01 : f32
    %269 = vector.broadcast %cst_101 : f32 to vector<8x128xf32>
    %270 = arith.mulf %269, %268 : vector<8x128xf32>
    %cst_102 = arith.constant 5.000000e-01 : f32
    %271 = vector.broadcast %cst_102 : f32 to vector<8x128xf32>
    %272 = arith.addf %270, %271 : vector<8x128xf32>
    %273 = vector.extract_strided_slice %272 {offsets = [0, 32], sizes = [8, 32], strides = [1, 1]} : vector<8x128xf32> to vector<8x32xf32>
    %274 = arith.mulf %273, %210 : vector<8x32xf32>
    %275 = vector.extract_strided_slice %272 {offsets = [0, 0], sizes = [8, 32], strides = [1, 1]} : vector<8x128xf32> to vector<8x32xf32>
    %276 = vector.extract_strided_slice %268 {offsets = [0, 64], sizes = [8, 32], strides = [1, 1]} : vector<8x128xf32> to vector<8x32xf32>
    %277 = arith.mulf %275, %276 : vector<8x32xf32>
    %278 = arith.addf %274, %277 : vector<8x32xf32>
    %279 = vector.extract_strided_slice %272 {offsets = [0, 96], sizes = [8, 32], strides = [1, 1]} : vector<8x128xf32> to vector<8x32xf32>
    %280 = math.tanh %278 : vector<8x32xf32>
    %281 = arith.mulf %279, %280 : vector<8x32xf32>
    %c0_103 = arith.constant 0 : index
    %c0_104 = arith.constant 0 : index
    %c0_105 = arith.constant 0 : index
    %282 = vector.load %arg1[%c0_103, %c0_104, %c0_105] : memref<3x64x128xf32, #tpu.memory_space<vmem>>, vector<1x64x128xf32>
    %283 = vector.shape_cast %282 : vector<1x64x128xf32> to vector<64x128xf32>
    %284 = vector.extract_strided_slice %7 {offsets = [40, 0], sizes = [8, 128], strides = [1, 1]} : vector<64x128xf32> to vector<8x128xf32>
    %285 = vector.extract_strided_slice %283 {offsets = [32, 0], sizes = [32, 128], strides = [1, 1]} : vector<64x128xf32> to vector<32x128xf32>
    %cst_106 = arith.constant dense<0.000000e+00> : vector<8x128xf32>
    %286 = tpu.matmul %233, %285, %cst_106 {dimension_numbers = #tpu.dot_dimension_numbers<[1], [0], [0], [1], [0, 0, 1, 1], [], []>} : vector<8x32xf32>, vector<32x128xf32>, vector<8x128xf32> -> vector<8x128xf32>
    %287 = arith.addf %284, %286 : vector<8x128xf32>
    %288 = math.tanh %287 : vector<8x128xf32>
    %cst_107 = arith.constant 5.000000e-01 : f32
    %289 = vector.broadcast %cst_107 : f32 to vector<8x128xf32>
    %290 = arith.mulf %289, %288 : vector<8x128xf32>
    %cst_108 = arith.constant 5.000000e-01 : f32
    %291 = vector.broadcast %cst_108 : f32 to vector<8x128xf32>
    %292 = arith.addf %290, %291 : vector<8x128xf32>
    %293 = vector.extract_strided_slice %292 {offsets = [0, 32], sizes = [8, 32], strides = [1, 1]} : vector<8x128xf32> to vector<8x32xf32>
    %294 = arith.mulf %293, %230 : vector<8x32xf32>
    %295 = vector.extract_strided_slice %292 {offsets = [0, 0], sizes = [8, 32], strides = [1, 1]} : vector<8x128xf32> to vector<8x32xf32>
    %296 = vector.extract_strided_slice %288 {offsets = [0, 64], sizes = [8, 32], strides = [1, 1]} : vector<8x128xf32> to vector<8x32xf32>
    %297 = arith.mulf %295, %296 : vector<8x32xf32>
    %298 = arith.addf %294, %297 : vector<8x32xf32>
    %299 = vector.extract_strided_slice %292 {offsets = [0, 96], sizes = [8, 32], strides = [1, 1]} : vector<8x128xf32> to vector<8x32xf32>
    %300 = math.tanh %298 : vector<8x32xf32>
    %301 = arith.mulf %299, %300 : vector<8x32xf32>
    %c1_109 = arith.constant 1 : index
    %c0_110 = arith.constant 0 : index
    %c0_111 = arith.constant 0 : index
    %302 = vector.load %arg1[%c1_109, %c0_110, %c0_111] : memref<3x64x128xf32, #tpu.memory_space<vmem>>, vector<1x64x128xf32>
    %303 = vector.shape_cast %302 : vector<1x64x128xf32> to vector<64x128xf32>
    %304 = vector.extract_strided_slice %303 {offsets = [0, 0], sizes = [32, 128], strides = [1, 1]} : vector<64x128xf32> to vector<32x128xf32>
    %cst_112 = arith.constant dense<0.000000e+00> : vector<8x128xf32>
    %305 = tpu.matmul %233, %304, %cst_112 {dimension_numbers = #tpu.dot_dimension_numbers<[1], [0], [0], [1], [0, 0, 1, 1], [], []>} : vector<8x32xf32>, vector<32x128xf32>, vector<8x128xf32> -> vector<8x128xf32>
    %c1_113 = arith.constant 1 : index
    %c0_114 = arith.constant 0 : index
    %306 = vector.load %arg2[%c1_113, %c0_114] : memref<8x128xf32, #tpu.memory_space<vmem>>, vector<1x128xf32>
    %307 = vector.broadcast %306 : vector<1x128xf32> to vector<8x128xf32>
    %308 = arith.addf %305, %307 : vector<8x128xf32>
    %309 = vector.extract_strided_slice %303 {offsets = [32, 0], sizes = [32, 128], strides = [1, 1]} : vector<64x128xf32> to vector<32x128xf32>
    %cst_115 = arith.constant dense<0.000000e+00> : vector<8x128xf32>
    %310 = tpu.matmul %257, %309, %cst_115 {dimension_numbers = #tpu.dot_dimension_numbers<[1], [0], [0], [1], [0, 0, 1, 1], [], []>} : vector<8x32xf32>, vector<32x128xf32>, vector<8x128xf32> -> vector<8x128xf32>
    %311 = arith.addf %308, %310 : vector<8x128xf32>
    %312 = math.tanh %311 : vector<8x128xf32>
    %cst_116 = arith.constant 5.000000e-01 : f32
    %313 = vector.broadcast %cst_116 : f32 to vector<8x128xf32>
    %314 = arith.mulf %313, %312 : vector<8x128xf32>
    %cst_117 = arith.constant 5.000000e-01 : f32
    %315 = vector.broadcast %cst_117 : f32 to vector<8x128xf32>
    %316 = arith.addf %314, %315 : vector<8x128xf32>
    %317 = vector.extract_strided_slice %316 {offsets = [0, 32], sizes = [8, 32], strides = [1, 1]} : vector<8x128xf32> to vector<8x32xf32>
    %318 = arith.mulf %317, %254 : vector<8x32xf32>
    %319 = vector.extract_strided_slice %316 {offsets = [0, 0], sizes = [8, 32], strides = [1, 1]} : vector<8x128xf32> to vector<8x32xf32>
    %320 = vector.extract_strided_slice %312 {offsets = [0, 64], sizes = [8, 32], strides = [1, 1]} : vector<8x128xf32> to vector<8x32xf32>
    %321 = arith.mulf %319, %320 : vector<8x32xf32>
    %322 = arith.addf %318, %321 : vector<8x32xf32>
    %323 = vector.extract_strided_slice %316 {offsets = [0, 96], sizes = [8, 32], strides = [1, 1]} : vector<8x128xf32> to vector<8x32xf32>
    %324 = math.tanh %322 : vector<8x32xf32>
    %325 = arith.mulf %323, %324 : vector<8x32xf32>
    %c2_118 = arith.constant 2 : index
    %c0_119 = arith.constant 0 : index
    %c0_120 = arith.constant 0 : index
    %326 = vector.load %arg1[%c2_118, %c0_119, %c0_120] : memref<3x64x128xf32, #tpu.memory_space<vmem>>, vector<1x64x128xf32>
    %327 = vector.shape_cast %326 : vector<1x64x128xf32> to vector<64x128xf32>
    %328 = vector.extract_strided_slice %327 {offsets = [0, 0], sizes = [32, 128], strides = [1, 1]} : vector<64x128xf32> to vector<32x128xf32>
    %cst_121 = arith.constant dense<0.000000e+00> : vector<8x128xf32>
    %329 = tpu.matmul %257, %328, %cst_121 {dimension_numbers = #tpu.dot_dimension_numbers<[1], [0], [0], [1], [0, 0, 1, 1], [], []>} : vector<8x32xf32>, vector<32x128xf32>, vector<8x128xf32> -> vector<8x128xf32>
    %c2_122 = arith.constant 2 : index
    %c0_123 = arith.constant 0 : index
    %330 = vector.load %arg2[%c2_122, %c0_123] : memref<8x128xf32, #tpu.memory_space<vmem>>, vector<1x128xf32>
    %331 = vector.broadcast %330 : vector<1x128xf32> to vector<8x128xf32>
    %332 = arith.addf %329, %331 : vector<8x128xf32>
    %333 = vector.extract_strided_slice %327 {offsets = [32, 0], sizes = [32, 128], strides = [1, 1]} : vector<64x128xf32> to vector<32x128xf32>
    %cst_124 = arith.constant dense<0.000000e+00> : vector<8x128xf32>
    %334 = tpu.matmul %281, %333, %cst_124 {dimension_numbers = #tpu.dot_dimension_numbers<[1], [0], [0], [1], [0, 0, 1, 1], [], []>} : vector<8x32xf32>, vector<32x128xf32>, vector<8x128xf32> -> vector<8x128xf32>
    %335 = arith.addf %332, %334 : vector<8x128xf32>
    %336 = math.tanh %335 : vector<8x128xf32>
    %cst_125 = arith.constant 5.000000e-01 : f32
    %337 = vector.broadcast %cst_125 : f32 to vector<8x128xf32>
    %338 = arith.mulf %337, %336 : vector<8x128xf32>
    %cst_126 = arith.constant 5.000000e-01 : f32
    %339 = vector.broadcast %cst_126 : f32 to vector<8x128xf32>
    %340 = arith.addf %338, %339 : vector<8x128xf32>
    %341 = vector.extract_strided_slice %340 {offsets = [0, 32], sizes = [8, 32], strides = [1, 1]} : vector<8x128xf32> to vector<8x32xf32>
    %342 = arith.mulf %341, %278 : vector<8x32xf32>
    %343 = vector.extract_strided_slice %340 {offsets = [0, 0], sizes = [8, 32], strides = [1, 1]} : vector<8x128xf32> to vector<8x32xf32>
    %344 = vector.extract_strided_slice %336 {offsets = [0, 64], sizes = [8, 32], strides = [1, 1]} : vector<8x128xf32> to vector<8x32xf32>
    %345 = arith.mulf %343, %344 : vector<8x32xf32>
    %346 = arith.addf %342, %345 : vector<8x32xf32>
    %347 = vector.extract_strided_slice %340 {offsets = [0, 96], sizes = [8, 32], strides = [1, 1]} : vector<8x128xf32> to vector<8x32xf32>
    %348 = math.tanh %346 : vector<8x32xf32>
    %349 = arith.mulf %347, %348 : vector<8x32xf32>
    %c0_127 = arith.constant 0 : index
    %c0_128 = arith.constant 0 : index
    %c0_129 = arith.constant 0 : index
    %350 = vector.load %arg1[%c0_127, %c0_128, %c0_129] : memref<3x64x128xf32, #tpu.memory_space<vmem>>, vector<1x64x128xf32>
    %351 = vector.shape_cast %350 : vector<1x64x128xf32> to vector<64x128xf32>
    %352 = vector.extract_strided_slice %7 {offsets = [48, 0], sizes = [8, 128], strides = [1, 1]} : vector<64x128xf32> to vector<8x128xf32>
    %353 = vector.extract_strided_slice %351 {offsets = [32, 0], sizes = [32, 128], strides = [1, 1]} : vector<64x128xf32> to vector<32x128xf32>
    %cst_130 = arith.constant dense<0.000000e+00> : vector<8x128xf32>
    %354 = tpu.matmul %301, %353, %cst_130 {dimension_numbers = #tpu.dot_dimension_numbers<[1], [0], [0], [1], [0, 0, 1, 1], [], []>} : vector<8x32xf32>, vector<32x128xf32>, vector<8x128xf32> -> vector<8x128xf32>
    %355 = arith.addf %352, %354 : vector<8x128xf32>
    %356 = math.tanh %355 : vector<8x128xf32>
    %cst_131 = arith.constant 5.000000e-01 : f32
    %357 = vector.broadcast %cst_131 : f32 to vector<8x128xf32>
    %358 = arith.mulf %357, %356 : vector<8x128xf32>
    %cst_132 = arith.constant 5.000000e-01 : f32
    %359 = vector.broadcast %cst_132 : f32 to vector<8x128xf32>
    %360 = arith.addf %358, %359 : vector<8x128xf32>
    %361 = vector.extract_strided_slice %360 {offsets = [0, 32], sizes = [8, 32], strides = [1, 1]} : vector<8x128xf32> to vector<8x32xf32>
    %362 = arith.mulf %361, %298 : vector<8x32xf32>
    %363 = vector.extract_strided_slice %360 {offsets = [0, 0], sizes = [8, 32], strides = [1, 1]} : vector<8x128xf32> to vector<8x32xf32>
    %364 = vector.extract_strided_slice %356 {offsets = [0, 64], sizes = [8, 32], strides = [1, 1]} : vector<8x128xf32> to vector<8x32xf32>
    %365 = arith.mulf %363, %364 : vector<8x32xf32>
    %366 = arith.addf %362, %365 : vector<8x32xf32>
    %367 = vector.extract_strided_slice %360 {offsets = [0, 96], sizes = [8, 32], strides = [1, 1]} : vector<8x128xf32> to vector<8x32xf32>
    %368 = math.tanh %366 : vector<8x32xf32>
    %369 = arith.mulf %367, %368 : vector<8x32xf32>
    %c1_133 = arith.constant 1 : index
    %c0_134 = arith.constant 0 : index
    %c0_135 = arith.constant 0 : index
    %370 = vector.load %arg1[%c1_133, %c0_134, %c0_135] : memref<3x64x128xf32, #tpu.memory_space<vmem>>, vector<1x64x128xf32>
    %371 = vector.shape_cast %370 : vector<1x64x128xf32> to vector<64x128xf32>
    %372 = vector.extract_strided_slice %371 {offsets = [0, 0], sizes = [32, 128], strides = [1, 1]} : vector<64x128xf32> to vector<32x128xf32>
    %cst_136 = arith.constant dense<0.000000e+00> : vector<8x128xf32>
    %373 = tpu.matmul %301, %372, %cst_136 {dimension_numbers = #tpu.dot_dimension_numbers<[1], [0], [0], [1], [0, 0, 1, 1], [], []>} : vector<8x32xf32>, vector<32x128xf32>, vector<8x128xf32> -> vector<8x128xf32>
    %c1_137 = arith.constant 1 : index
    %c0_138 = arith.constant 0 : index
    %374 = vector.load %arg2[%c1_137, %c0_138] : memref<8x128xf32, #tpu.memory_space<vmem>>, vector<1x128xf32>
    %375 = vector.broadcast %374 : vector<1x128xf32> to vector<8x128xf32>
    %376 = arith.addf %373, %375 : vector<8x128xf32>
    %377 = vector.extract_strided_slice %371 {offsets = [32, 0], sizes = [32, 128], strides = [1, 1]} : vector<64x128xf32> to vector<32x128xf32>
    %cst_139 = arith.constant dense<0.000000e+00> : vector<8x128xf32>
    %378 = tpu.matmul %325, %377, %cst_139 {dimension_numbers = #tpu.dot_dimension_numbers<[1], [0], [0], [1], [0, 0, 1, 1], [], []>} : vector<8x32xf32>, vector<32x128xf32>, vector<8x128xf32> -> vector<8x128xf32>
    %379 = arith.addf %376, %378 : vector<8x128xf32>
    %380 = math.tanh %379 : vector<8x128xf32>
    %cst_140 = arith.constant 5.000000e-01 : f32
    %381 = vector.broadcast %cst_140 : f32 to vector<8x128xf32>
    %382 = arith.mulf %381, %380 : vector<8x128xf32>
    %cst_141 = arith.constant 5.000000e-01 : f32
    %383 = vector.broadcast %cst_141 : f32 to vector<8x128xf32>
    %384 = arith.addf %382, %383 : vector<8x128xf32>
    %385 = vector.extract_strided_slice %384 {offsets = [0, 32], sizes = [8, 32], strides = [1, 1]} : vector<8x128xf32> to vector<8x32xf32>
    %386 = arith.mulf %385, %322 : vector<8x32xf32>
    %387 = vector.extract_strided_slice %384 {offsets = [0, 0], sizes = [8, 32], strides = [1, 1]} : vector<8x128xf32> to vector<8x32xf32>
    %388 = vector.extract_strided_slice %380 {offsets = [0, 64], sizes = [8, 32], strides = [1, 1]} : vector<8x128xf32> to vector<8x32xf32>
    %389 = arith.mulf %387, %388 : vector<8x32xf32>
    %390 = arith.addf %386, %389 : vector<8x32xf32>
    %391 = vector.extract_strided_slice %384 {offsets = [0, 96], sizes = [8, 32], strides = [1, 1]} : vector<8x128xf32> to vector<8x32xf32>
    %392 = math.tanh %390 : vector<8x32xf32>
    %393 = arith.mulf %391, %392 : vector<8x32xf32>
    %c2_142 = arith.constant 2 : index
    %c0_143 = arith.constant 0 : index
    %c0_144 = arith.constant 0 : index
    %394 = vector.load %arg1[%c2_142, %c0_143, %c0_144] : memref<3x64x128xf32, #tpu.memory_space<vmem>>, vector<1x64x128xf32>
    %395 = vector.shape_cast %394 : vector<1x64x128xf32> to vector<64x128xf32>
    %396 = vector.extract_strided_slice %395 {offsets = [0, 0], sizes = [32, 128], strides = [1, 1]} : vector<64x128xf32> to vector<32x128xf32>
    %cst_145 = arith.constant dense<0.000000e+00> : vector<8x128xf32>
    %397 = tpu.matmul %325, %396, %cst_145 {dimension_numbers = #tpu.dot_dimension_numbers<[1], [0], [0], [1], [0, 0, 1, 1], [], []>} : vector<8x32xf32>, vector<32x128xf32>, vector<8x128xf32> -> vector<8x128xf32>
    %c2_146 = arith.constant 2 : index
    %c0_147 = arith.constant 0 : index
    %398 = vector.load %arg2[%c2_146, %c0_147] : memref<8x128xf32, #tpu.memory_space<vmem>>, vector<1x128xf32>
    %399 = vector.broadcast %398 : vector<1x128xf32> to vector<8x128xf32>
    %400 = arith.addf %397, %399 : vector<8x128xf32>
    %401 = vector.extract_strided_slice %395 {offsets = [32, 0], sizes = [32, 128], strides = [1, 1]} : vector<64x128xf32> to vector<32x128xf32>
    %cst_148 = arith.constant dense<0.000000e+00> : vector<8x128xf32>
    %402 = tpu.matmul %349, %401, %cst_148 {dimension_numbers = #tpu.dot_dimension_numbers<[1], [0], [0], [1], [0, 0, 1, 1], [], []>} : vector<8x32xf32>, vector<32x128xf32>, vector<8x128xf32> -> vector<8x128xf32>
    %403 = arith.addf %400, %402 : vector<8x128xf32>
    %404 = math.tanh %403 : vector<8x128xf32>
    %cst_149 = arith.constant 5.000000e-01 : f32
    %405 = vector.broadcast %cst_149 : f32 to vector<8x128xf32>
    %406 = arith.mulf %405, %404 : vector<8x128xf32>
    %cst_150 = arith.constant 5.000000e-01 : f32
    %407 = vector.broadcast %cst_150 : f32 to vector<8x128xf32>
    %408 = arith.addf %406, %407 : vector<8x128xf32>
    %409 = vector.extract_strided_slice %408 {offsets = [0, 32], sizes = [8, 32], strides = [1, 1]} : vector<8x128xf32> to vector<8x32xf32>
    %410 = arith.mulf %409, %346 : vector<8x32xf32>
    %411 = vector.extract_strided_slice %408 {offsets = [0, 0], sizes = [8, 32], strides = [1, 1]} : vector<8x128xf32> to vector<8x32xf32>
    %412 = vector.extract_strided_slice %404 {offsets = [0, 64], sizes = [8, 32], strides = [1, 1]} : vector<8x128xf32> to vector<8x32xf32>
    %413 = arith.mulf %411, %412 : vector<8x32xf32>
    %414 = arith.addf %410, %413 : vector<8x32xf32>
    %415 = vector.extract_strided_slice %408 {offsets = [0, 96], sizes = [8, 32], strides = [1, 1]} : vector<8x128xf32> to vector<8x32xf32>
    %416 = math.tanh %414 : vector<8x32xf32>
    %417 = arith.mulf %415, %416 : vector<8x32xf32>
    %c0_151 = arith.constant 0 : index
    %c0_152 = arith.constant 0 : index
    %c0_153 = arith.constant 0 : index
    %418 = vector.load %arg1[%c0_151, %c0_152, %c0_153] : memref<3x64x128xf32, #tpu.memory_space<vmem>>, vector<1x64x128xf32>
    %419 = vector.shape_cast %418 : vector<1x64x128xf32> to vector<64x128xf32>
    %420 = vector.extract_strided_slice %7 {offsets = [56, 0], sizes = [8, 128], strides = [1, 1]} : vector<64x128xf32> to vector<8x128xf32>
    %421 = vector.extract_strided_slice %419 {offsets = [32, 0], sizes = [32, 128], strides = [1, 1]} : vector<64x128xf32> to vector<32x128xf32>
    %cst_154 = arith.constant dense<0.000000e+00> : vector<8x128xf32>
    %422 = tpu.matmul %369, %421, %cst_154 {dimension_numbers = #tpu.dot_dimension_numbers<[1], [0], [0], [1], [0, 0, 1, 1], [], []>} : vector<8x32xf32>, vector<32x128xf32>, vector<8x128xf32> -> vector<8x128xf32>
    %423 = arith.addf %420, %422 : vector<8x128xf32>
    %424 = math.tanh %423 : vector<8x128xf32>
    %cst_155 = arith.constant 5.000000e-01 : f32
    %425 = vector.broadcast %cst_155 : f32 to vector<8x128xf32>
    %426 = arith.mulf %425, %424 : vector<8x128xf32>
    %cst_156 = arith.constant 5.000000e-01 : f32
    %427 = vector.broadcast %cst_156 : f32 to vector<8x128xf32>
    %428 = arith.addf %426, %427 : vector<8x128xf32>
    %429 = vector.extract_strided_slice %428 {offsets = [0, 32], sizes = [8, 32], strides = [1, 1]} : vector<8x128xf32> to vector<8x32xf32>
    %430 = arith.mulf %429, %366 : vector<8x32xf32>
    %431 = vector.extract_strided_slice %428 {offsets = [0, 0], sizes = [8, 32], strides = [1, 1]} : vector<8x128xf32> to vector<8x32xf32>
    %432 = vector.extract_strided_slice %424 {offsets = [0, 64], sizes = [8, 32], strides = [1, 1]} : vector<8x128xf32> to vector<8x32xf32>
    %433 = arith.mulf %431, %432 : vector<8x32xf32>
    %434 = arith.addf %430, %433 : vector<8x32xf32>
    %435 = vector.extract_strided_slice %428 {offsets = [0, 96], sizes = [8, 32], strides = [1, 1]} : vector<8x128xf32> to vector<8x32xf32>
    %436 = math.tanh %434 : vector<8x32xf32>
    %437 = arith.mulf %435, %436 : vector<8x32xf32>
    %c1_157 = arith.constant 1 : index
    %c0_158 = arith.constant 0 : index
    %c0_159 = arith.constant 0 : index
    %438 = vector.load %arg1[%c1_157, %c0_158, %c0_159] : memref<3x64x128xf32, #tpu.memory_space<vmem>>, vector<1x64x128xf32>
    %439 = vector.shape_cast %438 : vector<1x64x128xf32> to vector<64x128xf32>
    %440 = vector.extract_strided_slice %439 {offsets = [0, 0], sizes = [32, 128], strides = [1, 1]} : vector<64x128xf32> to vector<32x128xf32>
    %cst_160 = arith.constant dense<0.000000e+00> : vector<8x128xf32>
    %441 = tpu.matmul %369, %440, %cst_160 {dimension_numbers = #tpu.dot_dimension_numbers<[1], [0], [0], [1], [0, 0, 1, 1], [], []>} : vector<8x32xf32>, vector<32x128xf32>, vector<8x128xf32> -> vector<8x128xf32>
    %c1_161 = arith.constant 1 : index
    %c0_162 = arith.constant 0 : index
    %442 = vector.load %arg2[%c1_161, %c0_162] : memref<8x128xf32, #tpu.memory_space<vmem>>, vector<1x128xf32>
    %443 = vector.broadcast %442 : vector<1x128xf32> to vector<8x128xf32>
    %444 = arith.addf %441, %443 : vector<8x128xf32>
    %445 = vector.extract_strided_slice %439 {offsets = [32, 0], sizes = [32, 128], strides = [1, 1]} : vector<64x128xf32> to vector<32x128xf32>
    %cst_163 = arith.constant dense<0.000000e+00> : vector<8x128xf32>
    %446 = tpu.matmul %393, %445, %cst_163 {dimension_numbers = #tpu.dot_dimension_numbers<[1], [0], [0], [1], [0, 0, 1, 1], [], []>} : vector<8x32xf32>, vector<32x128xf32>, vector<8x128xf32> -> vector<8x128xf32>
    %447 = arith.addf %444, %446 : vector<8x128xf32>
    %448 = math.tanh %447 : vector<8x128xf32>
    %cst_164 = arith.constant 5.000000e-01 : f32
    %449 = vector.broadcast %cst_164 : f32 to vector<8x128xf32>
    %450 = arith.mulf %449, %448 : vector<8x128xf32>
    %cst_165 = arith.constant 5.000000e-01 : f32
    %451 = vector.broadcast %cst_165 : f32 to vector<8x128xf32>
    %452 = arith.addf %450, %451 : vector<8x128xf32>
    %453 = vector.extract_strided_slice %452 {offsets = [0, 32], sizes = [8, 32], strides = [1, 1]} : vector<8x128xf32> to vector<8x32xf32>
    %454 = arith.mulf %453, %390 : vector<8x32xf32>
    %455 = vector.extract_strided_slice %452 {offsets = [0, 0], sizes = [8, 32], strides = [1, 1]} : vector<8x128xf32> to vector<8x32xf32>
    %456 = vector.extract_strided_slice %448 {offsets = [0, 64], sizes = [8, 32], strides = [1, 1]} : vector<8x128xf32> to vector<8x32xf32>
    %457 = arith.mulf %455, %456 : vector<8x32xf32>
    %458 = arith.addf %454, %457 : vector<8x32xf32>
    %459 = vector.extract_strided_slice %452 {offsets = [0, 96], sizes = [8, 32], strides = [1, 1]} : vector<8x128xf32> to vector<8x32xf32>
    %460 = math.tanh %458 : vector<8x32xf32>
    %461 = arith.mulf %459, %460 : vector<8x32xf32>
    %c2_166 = arith.constant 2 : index
    %c0_167 = arith.constant 0 : index
    %c0_168 = arith.constant 0 : index
    %462 = vector.load %arg1[%c2_166, %c0_167, %c0_168] : memref<3x64x128xf32, #tpu.memory_space<vmem>>, vector<1x64x128xf32>
    %463 = vector.shape_cast %462 : vector<1x64x128xf32> to vector<64x128xf32>
    %464 = vector.extract_strided_slice %463 {offsets = [0, 0], sizes = [32, 128], strides = [1, 1]} : vector<64x128xf32> to vector<32x128xf32>
    %cst_169 = arith.constant dense<0.000000e+00> : vector<8x128xf32>
    %465 = tpu.matmul %393, %464, %cst_169 {dimension_numbers = #tpu.dot_dimension_numbers<[1], [0], [0], [1], [0, 0, 1, 1], [], []>} : vector<8x32xf32>, vector<32x128xf32>, vector<8x128xf32> -> vector<8x128xf32>
    %c2_170 = arith.constant 2 : index
    %c0_171 = arith.constant 0 : index
    %466 = vector.load %arg2[%c2_170, %c0_171] : memref<8x128xf32, #tpu.memory_space<vmem>>, vector<1x128xf32>
    %467 = vector.broadcast %466 : vector<1x128xf32> to vector<8x128xf32>
    %468 = arith.addf %465, %467 : vector<8x128xf32>
    %469 = vector.extract_strided_slice %463 {offsets = [32, 0], sizes = [32, 128], strides = [1, 1]} : vector<64x128xf32> to vector<32x128xf32>
    %cst_172 = arith.constant dense<0.000000e+00> : vector<8x128xf32>
    %470 = tpu.matmul %417, %469, %cst_172 {dimension_numbers = #tpu.dot_dimension_numbers<[1], [0], [0], [1], [0, 0, 1, 1], [], []>} : vector<8x32xf32>, vector<32x128xf32>, vector<8x128xf32> -> vector<8x128xf32>
    %471 = arith.addf %468, %470 : vector<8x128xf32>
    %472 = math.tanh %471 : vector<8x128xf32>
    %cst_173 = arith.constant 5.000000e-01 : f32
    %473 = vector.broadcast %cst_173 : f32 to vector<8x128xf32>
    %474 = arith.mulf %473, %472 : vector<8x128xf32>
    %cst_174 = arith.constant 5.000000e-01 : f32
    %475 = vector.broadcast %cst_174 : f32 to vector<8x128xf32>
    %476 = arith.addf %474, %475 : vector<8x128xf32>
    %477 = vector.extract_strided_slice %476 {offsets = [0, 32], sizes = [8, 32], strides = [1, 1]} : vector<8x128xf32> to vector<8x32xf32>
    %478 = arith.mulf %477, %414 : vector<8x32xf32>
    %479 = vector.extract_strided_slice %476 {offsets = [0, 0], sizes = [8, 32], strides = [1, 1]} : vector<8x128xf32> to vector<8x32xf32>
    %480 = vector.extract_strided_slice %472 {offsets = [0, 64], sizes = [8, 32], strides = [1, 1]} : vector<8x128xf32> to vector<8x32xf32>
    %481 = arith.mulf %479, %480 : vector<8x32xf32>
    %482 = arith.addf %478, %481 : vector<8x32xf32>
    %483 = vector.extract_strided_slice %476 {offsets = [0, 96], sizes = [8, 32], strides = [1, 1]} : vector<8x128xf32> to vector<8x32xf32>
    %484 = math.tanh %482 : vector<8x32xf32>
    %485 = arith.mulf %483, %484 : vector<8x32xf32>
    %c1_175 = arith.constant 1 : index
    %c0_176 = arith.constant 0 : index
    %c0_177 = arith.constant 0 : index
    %486 = vector.load %arg1[%c1_175, %c0_176, %c0_177] : memref<3x64x128xf32, #tpu.memory_space<vmem>>, vector<1x64x128xf32>
    %487 = vector.shape_cast %486 : vector<1x64x128xf32> to vector<64x128xf32>
    %488 = vector.extract_strided_slice %487 {offsets = [0, 0], sizes = [32, 128], strides = [1, 1]} : vector<64x128xf32> to vector<32x128xf32>
    %cst_178 = arith.constant dense<0.000000e+00> : vector<8x128xf32>
    %489 = tpu.matmul %437, %488, %cst_178 {dimension_numbers = #tpu.dot_dimension_numbers<[1], [0], [0], [1], [0, 0, 1, 1], [], []>} : vector<8x32xf32>, vector<32x128xf32>, vector<8x128xf32> -> vector<8x128xf32>
    %c1_179 = arith.constant 1 : index
    %c0_180 = arith.constant 0 : index
    %490 = vector.load %arg2[%c1_179, %c0_180] : memref<8x128xf32, #tpu.memory_space<vmem>>, vector<1x128xf32>
    %491 = vector.broadcast %490 : vector<1x128xf32> to vector<8x128xf32>
    %492 = arith.addf %489, %491 : vector<8x128xf32>
    %493 = vector.extract_strided_slice %487 {offsets = [32, 0], sizes = [32, 128], strides = [1, 1]} : vector<64x128xf32> to vector<32x128xf32>
    %cst_181 = arith.constant dense<0.000000e+00> : vector<8x128xf32>
    %494 = tpu.matmul %461, %493, %cst_181 {dimension_numbers = #tpu.dot_dimension_numbers<[1], [0], [0], [1], [0, 0, 1, 1], [], []>} : vector<8x32xf32>, vector<32x128xf32>, vector<8x128xf32> -> vector<8x128xf32>
    %495 = arith.addf %492, %494 : vector<8x128xf32>
    %496 = math.tanh %495 : vector<8x128xf32>
    %cst_182 = arith.constant 5.000000e-01 : f32
    %497 = vector.broadcast %cst_182 : f32 to vector<8x128xf32>
    %498 = arith.mulf %497, %496 : vector<8x128xf32>
    %cst_183 = arith.constant 5.000000e-01 : f32
    %499 = vector.broadcast %cst_183 : f32 to vector<8x128xf32>
    %500 = arith.addf %498, %499 : vector<8x128xf32>
    %501 = vector.extract_strided_slice %500 {offsets = [0, 32], sizes = [8, 32], strides = [1, 1]} : vector<8x128xf32> to vector<8x32xf32>
    %502 = arith.mulf %501, %458 : vector<8x32xf32>
    %503 = vector.extract_strided_slice %500 {offsets = [0, 0], sizes = [8, 32], strides = [1, 1]} : vector<8x128xf32> to vector<8x32xf32>
    %504 = vector.extract_strided_slice %496 {offsets = [0, 64], sizes = [8, 32], strides = [1, 1]} : vector<8x128xf32> to vector<8x32xf32>
    %505 = arith.mulf %503, %504 : vector<8x32xf32>
    %506 = arith.addf %502, %505 : vector<8x32xf32>
    %507 = vector.extract_strided_slice %500 {offsets = [0, 96], sizes = [8, 32], strides = [1, 1]} : vector<8x128xf32> to vector<8x32xf32>
    %508 = math.tanh %506 : vector<8x32xf32>
    %509 = arith.mulf %507, %508 : vector<8x32xf32>
    %c2_184 = arith.constant 2 : index
    %c0_185 = arith.constant 0 : index
    %c0_186 = arith.constant 0 : index
    %510 = vector.load %arg1[%c2_184, %c0_185, %c0_186] : memref<3x64x128xf32, #tpu.memory_space<vmem>>, vector<1x64x128xf32>
    %511 = vector.shape_cast %510 : vector<1x64x128xf32> to vector<64x128xf32>
    %512 = vector.extract_strided_slice %511 {offsets = [0, 0], sizes = [32, 128], strides = [1, 1]} : vector<64x128xf32> to vector<32x128xf32>
    %cst_187 = arith.constant dense<0.000000e+00> : vector<8x128xf32>
    %513 = tpu.matmul %461, %512, %cst_187 {dimension_numbers = #tpu.dot_dimension_numbers<[1], [0], [0], [1], [0, 0, 1, 1], [], []>} : vector<8x32xf32>, vector<32x128xf32>, vector<8x128xf32> -> vector<8x128xf32>
    %c2_188 = arith.constant 2 : index
    %c0_189 = arith.constant 0 : index
    %514 = vector.load %arg2[%c2_188, %c0_189] : memref<8x128xf32, #tpu.memory_space<vmem>>, vector<1x128xf32>
    %515 = vector.broadcast %514 : vector<1x128xf32> to vector<8x128xf32>
    %516 = arith.addf %513, %515 : vector<8x128xf32>
    %517 = vector.extract_strided_slice %511 {offsets = [32, 0], sizes = [32, 128], strides = [1, 1]} : vector<64x128xf32> to vector<32x128xf32>
    %cst_190 = arith.constant dense<0.000000e+00> : vector<8x128xf32>
    %518 = tpu.matmul %485, %517, %cst_190 {dimension_numbers = #tpu.dot_dimension_numbers<[1], [0], [0], [1], [0, 0, 1, 1], [], []>} : vector<8x32xf32>, vector<32x128xf32>, vector<8x128xf32> -> vector<8x128xf32>
    %519 = arith.addf %516, %518 : vector<8x128xf32>
    %520 = math.tanh %519 : vector<8x128xf32>
    %cst_191 = arith.constant 5.000000e-01 : f32
    %521 = vector.broadcast %cst_191 : f32 to vector<8x128xf32>
    %522 = arith.mulf %521, %520 : vector<8x128xf32>
    %cst_192 = arith.constant 5.000000e-01 : f32
    %523 = vector.broadcast %cst_192 : f32 to vector<8x128xf32>
    %524 = arith.addf %522, %523 : vector<8x128xf32>
    %525 = vector.extract_strided_slice %524 {offsets = [0, 32], sizes = [8, 32], strides = [1, 1]} : vector<8x128xf32> to vector<8x32xf32>
    %526 = arith.mulf %525, %482 : vector<8x32xf32>
    %527 = vector.extract_strided_slice %524 {offsets = [0, 0], sizes = [8, 32], strides = [1, 1]} : vector<8x128xf32> to vector<8x32xf32>
    %528 = vector.extract_strided_slice %520 {offsets = [0, 64], sizes = [8, 32], strides = [1, 1]} : vector<8x128xf32> to vector<8x32xf32>
    %529 = arith.mulf %527, %528 : vector<8x32xf32>
    %530 = arith.addf %526, %529 : vector<8x32xf32>
    %531 = vector.extract_strided_slice %524 {offsets = [0, 96], sizes = [8, 32], strides = [1, 1]} : vector<8x128xf32> to vector<8x32xf32>
    %532 = math.tanh %530 : vector<8x32xf32>
    %533 = arith.mulf %531, %532 : vector<8x32xf32>
    %c2_193 = arith.constant 2 : index
    %c0_194 = arith.constant 0 : index
    %c0_195 = arith.constant 0 : index
    %534 = vector.load %arg1[%c2_193, %c0_194, %c0_195] : memref<3x64x128xf32, #tpu.memory_space<vmem>>, vector<1x64x128xf32>
    %535 = vector.shape_cast %534 : vector<1x64x128xf32> to vector<64x128xf32>
    %536 = vector.extract_strided_slice %535 {offsets = [0, 0], sizes = [32, 128], strides = [1, 1]} : vector<64x128xf32> to vector<32x128xf32>
    %cst_196 = arith.constant dense<0.000000e+00> : vector<8x128xf32>
    %537 = tpu.matmul %509, %536, %cst_196 {dimension_numbers = #tpu.dot_dimension_numbers<[1], [0], [0], [1], [0, 0, 1, 1], [], []>} : vector<8x32xf32>, vector<32x128xf32>, vector<8x128xf32> -> vector<8x128xf32>
    %c2_197 = arith.constant 2 : index
    %c0_198 = arith.constant 0 : index
    %538 = vector.load %arg2[%c2_197, %c0_198] : memref<8x128xf32, #tpu.memory_space<vmem>>, vector<1x128xf32>
    %539 = vector.broadcast %538 : vector<1x128xf32> to vector<8x128xf32>
    %540 = arith.addf %537, %539 : vector<8x128xf32>
    %541 = vector.extract_strided_slice %535 {offsets = [32, 0], sizes = [32, 128], strides = [1, 1]} : vector<64x128xf32> to vector<32x128xf32>
    %cst_199 = arith.constant dense<0.000000e+00> : vector<8x128xf32>
    %542 = tpu.matmul %533, %541, %cst_199 {dimension_numbers = #tpu.dot_dimension_numbers<[1], [0], [0], [1], [0, 0, 1, 1], [], []>} : vector<8x32xf32>, vector<32x128xf32>, vector<8x128xf32> -> vector<8x128xf32>
    %543 = arith.addf %540, %542 : vector<8x128xf32>
    %544 = math.tanh %543 : vector<8x128xf32>
    %cst_200 = arith.constant 5.000000e-01 : f32
    %545 = vector.broadcast %cst_200 : f32 to vector<8x128xf32>
    %546 = arith.mulf %545, %544 : vector<8x128xf32>
    %cst_201 = arith.constant 5.000000e-01 : f32
    %547 = vector.broadcast %cst_201 : f32 to vector<8x128xf32>
    %548 = arith.addf %546, %547 : vector<8x128xf32>
    %549 = vector.extract_strided_slice %548 {offsets = [0, 32], sizes = [8, 32], strides = [1, 1]} : vector<8x128xf32> to vector<8x32xf32>
    %550 = arith.mulf %549, %530 : vector<8x32xf32>
    %551 = vector.extract_strided_slice %548 {offsets = [0, 0], sizes = [8, 32], strides = [1, 1]} : vector<8x128xf32> to vector<8x32xf32>
    %552 = vector.extract_strided_slice %544 {offsets = [0, 64], sizes = [8, 32], strides = [1, 1]} : vector<8x128xf32> to vector<8x32xf32>
    %553 = arith.mulf %551, %552 : vector<8x32xf32>
    %554 = arith.addf %550, %553 : vector<8x32xf32>
    %555 = vector.extract_strided_slice %548 {offsets = [0, 96], sizes = [8, 32], strides = [1, 1]} : vector<8x128xf32> to vector<8x32xf32>
    %556 = math.tanh %554 : vector<8x32xf32>
    %557 = arith.mulf %555, %556 : vector<8x32xf32>
    %558 = tpu.concatenate %145, %213, %281, %349, %417, %485, %533, %557 in 0 : vector<8x32xf32>, vector<8x32xf32>, vector<8x32xf32>, vector<8x32xf32>, vector<8x32xf32>, vector<8x32xf32>, vector<8x32xf32>, vector<8x32xf32> -> vector<64x32xf32>
    %c3 = arith.constant 3 : index
    %c0_202 = arith.constant 0 : index
    %559 = vector.load %arg2[%c3, %c0_202] : memref<8x128xf32, #tpu.memory_space<vmem>>, vector<1x32xf32>
    %c4 = arith.constant 4 : index
    %c0_203 = arith.constant 0 : index
    %560 = vector.load %arg2[%c4, %c0_203] : memref<8x128xf32, #tpu.memory_space<vmem>>, vector<1x1xf32>
    %561 = vector.broadcast %559 : vector<1x32xf32> to vector<64x32xf32>
    %562 = arith.mulf %558, %561 : vector<64x32xf32>
    %cst_204 = arith.constant dense<0.000000e+00> : vector<64xf32>
    %563 = vector.multi_reduction <add>, %562, %cst_204 [1] : vector<64x32xf32> to vector<64xf32>
    %564 = vector.shape_cast %563 : vector<64xf32> to vector<64x1xf32>
    %565 = vector.broadcast %560 : vector<1x1xf32> to vector<64x1xf32>
    %566 = arith.addf %564, %565 : vector<64x1xf32>
    %cst_205 = arith.constant 0.000000e+00 : f32
    %567 = vector.broadcast %cst_205 : f32 to vector<64x1xf32>
    %568 = arith.maximumf %566, %567 : vector<64x1xf32>
    %c0_206 = arith.constant 0 : index
    %c0_207 = arith.constant 0 : index
    %569 = vector.load %arg3[%c0_206, %c0_207] : memref<64x1xf32, #tpu.memory_space<vmem>>, vector<64x1xf32>
    tpu.vector_store %arg3[%c0_206, %c0_207], %568 {strides = array<i32>} : memref<64x1xf32, #tpu.memory_space<vmem>>, vector<64x1xf32>,
    return
  }
}

</mosaic_0001>

<bundles_post_ra>
// kernel: tpu_custom_call.1
= control target key start
LH: loop header
LB: loop body
LE: loop exit
PB: predicated region body
PF: predicated region fallthrough
CT: control target
= control target key end

     0   :  { %8 = vsyncpa [#allocation3], 0  ;;  %s4891_s12 = smov [#allocation2]   ;;  %s5588_s0 = inlined_call_operand.vmem [shape: f32[64,32], index: 0, kind: input, shape index: {}]   ;;  %s5589_s1 = inlined_call_operand.hbm [shape: f32[3,64,128], index: 1, kind: input, shape index: {}]   ;;  %s5590_s2 = inlined_call_operand.vmem [shape: f32[8,128], index: 2, kind: input, shape index: {}]   ;;  %s5591_s3 = inlined_call_operand.vmem [shape: f32[64,1], index: 3, kind: output, shape index: {}]  }
   0x1   :  { %s16_s13 = sshll.u32 %s4891_s12, 4  ;;  %s4867_s16 = scalar_lea.hbm %s5589_s1, 3072  ;;  %s17_s13 = int_to_ptr.vmem [resolvable:$true] %s16_s13 }
   0x2   :  { %p4868_p0 = scmp.ne.s32.totalorder %s5589_s1, %s4867_s16  ;;  %p4871_p1 = scmp.lt.u32.totalorder %s4867_s16, %s5589_s1 }
   0x4   :  { %p4873_p2 = pnand %p4871_p1, %p4868_p0 }
   0x6   :  { %4876 = shalt.err (!%p4873_p2)
}
   0x7   :  { %s4877_s21 = scalar_lea.vmem %s17_s13, 3072  ;;  %p4882_p4 = scmp.lt.s32.totalorder %s17_s13, %s17_s13 }
   0x8   :  { %p4878_p3 = scmp.ne.s32.totalorder %s17_s13, %s4877_s21  ;;  %p4883_p5 = scmp.lt.s32.totalorder %s4877_s21, %s4877_s21 }
   0xa   :  { %p4884_p6 = por %p4883_p5, %p4882_p4 }
   0xc   :  { %p4885_p7 = pnand %p4884_p6, %p4878_p3 }
   0xe   :  { %4888 = shalt.err (!%p4885_p7)
}
   0xf   :  { %s4892_s22 = smov 128   ;;  %s4893_s23 = smov 8  }
  0x10   :  { %22 = dma.hbm_to_vmem [thread:$0]  %s5589_s1, 3072, %s17_s13, [#allocation3], %s4892_s22, %s4892_s22, %s4893_s23  }
  0x11   :  { %4889 = dma.done.wait [#allocation3], 3072  }
  0x12   :  { %4890 = vsyncadd [#allocation3], 4294964224  ;;  %vm49_vm0 = vcmask 261120   ;;  %v36_v0 = vld [vmem:[#allocation2] sm:$0xff]  ;;  %v37_v1 = vld [vmem:[#allocation2 + $0x8] sm:$0xff]  ;;  %v4894_v13 = vmov 0.0|0.0  }
  0x13   :  { %v38_v2 = vld [vmem:[#allocation2 + $0x10] sm:$0xff]  ;;  %v4459_v3 = vpack.c.bf16 %v37_v1, %v36_v0  ;;  %v39_v4 = vld [vmem:[#allocation2 + $0x18] sm:$0xff]  ;;  %v32_v5 = vld [vmem:[%s5588_s0 + $0x20] sm:$0xff]  ;;  %vm4895_vm1 = vmmov 0   ;;  %v4896_v19 = vmov 0.0   ;;  %s4897_s12 = smov 64  }
  0x14   :  { %v4463_v6 = vpack.c.bf16 %v39_v4, %v38_v2  ;;  %4013 = vmatprep.mubr.msk.f32.mxu1 %vm49_vm0, %v32_v5  ;;  %v28_v7 = vld [vmem:[%s5588_s0] sm:$0xff]  ;;  %v41_v9 = vld [vmem:[#allocation2 + $0x28] sm:$0xff]  ;;  %v34_v14 = vld [vmem:[%s5588_s0 + $0x30] sm:$0xff]  ;;  %s4898_s13 = smov 32   ;;  %s4899_s29 = smov 96   ;;  %vm3723_vm2 = vcmask 7168  }
  0x15   :  { %4707 = vmatprep.subr.bf16.mxu1 %v4459_v3  ;;  %4460 = vmatprep.subr.bf16.mxu0 %v4459_v3  ;;  %v40_v8 = vld [vmem:[#allocation2 + $0x20] sm:$0xff]  ;;  %v33_v10 = vld [vmem:[%s5588_s0 + $0x28] sm:$0xff]  ;;  %v42_v15 = vld [vmem:[#allocation2 + $0x30] sm:$0xff] }
  0x16   :  { %4709 = vmatpush3.bf16.msra.mxu1 %v4459_v3  ;;  %4462 = vmatpush3.bf16.msra.mxu0 %v4459_v3  ;;  %v4943_v11 = vpack.c.bf16 %v41_v9, %v40_v8  ;;  %v29_v12 = vld [vmem:[%s5588_s0 + $0x8] sm:$0xff]  ;;  %v43_v16 = vld [vmem:[#allocation2 + $0x38] sm:$0xff]  ;;  %v4984_v24 = vld [vmem:[%s5590_s2] ss:$0 sm:$0xff] }
  0x17   :  { %4708 = vmatprep.subr.bf16.mxu1 %v4463_v6  ;;  %4464 = vmatprep.subr.bf16.mxu0 %v4463_v6  ;;  %v35_v17 = vld [vmem:[%s5588_s0 + $0x38] sm:$0xff]  ;;  %v4960_v18 = vpack.c.bf16 %v43_v16, %v42_v15  ;;  %v370_v39 = vld [vmem:[#allocation2 + $0x40] sm:$0xff]  ;;  %v371_v40 = vld [vmem:[#allocation2 + $0x48] sm:$0xff] }
  0x18   :  { %4007 = vmatprep.mubr.msk.f32.mxu0 %vm49_vm0, %v28_v7  ;;  %v30_v41 = vld [vmem:[%s5588_s0 + $0x10] sm:$0xff]  ;;  %v4999_v42 = vpack.c.bf16 %v371_v40, %v370_v39  ;;  %v31_v43 = vld [vmem:[%s5588_s0 + $0x18] sm:$0xff]  ;;  %v374_v50 = vld [vmem:[#allocation2 + $0x60] sm:$0xff] }
  0x19   :  { %v372_v44 = vld [vmem:[#allocation2 + $0x50] sm:$0xff]  ;;  %v373_v45 = vld [vmem:[#allocation2 + $0x58] sm:$0xff]  ;;  %v375_v51 = vld [vmem:[#allocation2 + $0x68] sm:$0xff] }
  0x1a   :  { %4710 = vmatpush3.bf16.msra.mxu1 %v4463_v6  ;;  %4466 = vmatpush3.bf16.msra.mxu0 %v4463_v6  ;;  %v5007_v46 = vpack.c.bf16 %v373_v45, %v372_v44  ;;  %v5016_v52 = vpack.c.bf16 %v375_v51, %v374_v50  ;;  %v376_v53 = vld [vmem:[#allocation2 + $0x70] sm:$0xff]  ;;  %v377_v54 = vld [vmem:[#allocation2 + $0x78] sm:$0xff]  ;;  %v5046_v63 = vld [vmem:[%s5590_s2 + $0x1] ss:$0 sm:$0xff] }
  0x1b   :  { %4467 = vmatprep.subr.bf16.mxu1 %v4894_v13  ;;  %4479 = vmatprep.subr.bf16.mxu0 %v4894_v13  ;;  %v5021_v56 = vpack.c.bf16 %v377_v54, %v376_v53  ;;  %v813_v45 = vld [vmem:[#allocation2 + $0xb0] sm:$0xff] }
  0x1d   :  { %4014 = vmatmul.mubr.msk.f32.vlgmr.msra.gmra.mrb[0].mxu1 %vm49_vm0, %v33_v10  ;;  %4008 = vmatmul.mubr.msk.f32.vlgmr.msra.gmra.mrb[0].mxu0 %vm49_vm0, %v29_v12 }
  0x1e   :  { %4469 = vmatpush3.bf16.msra.mxu1 %v4943_v11  ;;  %4016 = vmatprep.mubr.msk.f32.mxu1 %vm49_vm0, %v34_v14 }
  0x1f   :  { %4470 = vmatprep.subr.bf16.mxu1 %v4894_v13  ;;  %4010 = vmatprep.mubr.msk.f32.mxu0 %vm49_vm0, %v30_v41  ;;  %v811_v41 = vld [vmem:[#allocation2 + $0xa0] sm:$0xff] }
  0x20   :  { %4481 = vmatpush3.bf16.msra.mxu0 %v4999_v42 }
  0x21   :  { %4017 = vmatmul.mubr.msk.f32.gmra.mrb[2].mxu1 %vm49_vm0, %v35_v17  ;;  %4011 = vmatmul.mubr.msk.f32.gmra.mrb[2].mxu0 %vm49_vm0, %v31_v43  ;;  %v812_v43 = vld [vmem:[#allocation2 + $0xa8] sm:$0xff] }
  0x22   :  { %4472 = vmatpush3.bf16.msra.mxu1 %v4960_v18  ;;  %4027 = vmatprep.mubr.msk.f32.mxu1 %vm4895_vm1, %v4896_v19  ;;  %v5078_v44 = vpack.c.bf16 %v812_v43, %v811_v41 }
  0x23   :  { %4473 = vmatprep.subr.bf16.mxu1 %v4894_v13  ;;  %4049 = vmatprep.mubr.msk.f32.mxu0 %vm4895_vm1, %v4896_v19 }
  0x24   :  { %4482 = vmatprep.subr.bf16.mxu0 %v4894_v13 }
  0x25   :  { %4028 = vmatmul.mubr.f32.vlgmr.msra.gmra.mrb[4].mxu1 %v4896_v19  ;;  %4484 = vmatpush3.bf16.msra.mxu0 %v5007_v46 }
  0x26   :  { %4475 = vmatpush3.bf16.msra.mxu1 %v4943_v11  ;;  %4038 = vmatprep.mubr.msk.f32.mxu1 %vm4895_vm1, %v4896_v19 }
  0x27   :  { %4476 = vmatprep.subr.bf16.mxu1 %v4894_v13  ;;  %4485 = vmatprep.subr.bf16.mxu0 %v4894_v13 }
  0x2a   :  { %4478 = vmatpush3.bf16.msra.mxu1 %v4960_v18 }
  0x2b   :  { %4491 = vmatprep.subr.bf16.mxu1 %v4894_v13 }
  0xf0   :  { %v4975_v20 = vpop.f32.mrb[0].mxu1  ;;  %v4977_v21 = vpop.f32.mrb[0].mxu0 }
  0xf1   :  { %v4979_v22 = vpop.f32.mrb[1].mxu1  ;;  %v140_v23 = vpop.f32.mrb[1].mxu0  ;;  %v146_v59 = vadd.f32 %v4977_v21, %v4984_v24 }
  0xf2   :  { %v141_v26 = vadd.f32 %v4984_v24, %v140_v23 }
  0xf4   :  { %v4986_v25 = vpop.f32.mrb[2].mxu1  ;;  %v5037_v57 = vpop.f32.mrb[2].mxu0 }
  0xf5   :  { %v4989_v27 = vpop.f32.mrb[3].mxu1  ;;  %v5039_v58 = vpop.f32.mrb[3].mxu0 }
  0xf6   :  { %v151_v50 = vadd.f32 %v4984_v24, %v5039_v58 }
  0xf8   :  { %v248_v28 = vpop.f32.mrb[4].mxu1 }
  0xf9   :  { %v252_v29 = vadd.f32 %v248_v28, %v141_v26  ;;  %v4029_v30 = vpop.f32.mrb[5].mxu1 }
  0xfa   :  { %v807_v30 = vld [vmem:[#allocation2 + $0x80] sm:$0xff] }
  0xfb   :  { %4768 = vtanh.f32 %v252_v29 }
 0x105   :  { %v4769_v31 = vpop.eup %4768 }
 0x106   :  { %258 = vrot.lane.b32.xlu0 %v4769_v31, %s4897_s12  ;;  %v254_v32 = vmul.f32 0.5, %v4769_v31  ;;  %v808_v31 = vld [vmem:[#allocation2 + $0x88] sm:$0xff] }
 0x108   :  { %v255_v33 = vadd.f32 0.5, %v254_v32  ;;  %v5062_v32 = vpack.c.bf16 %v808_v31, %v807_v30 }
 0x10a   :  { %v256_v36 = vmul.f32 0.0, %v255_v33 }
 0x178   :  { %v259_v34 = vpop.permute.xlu0 %258 }
 0x179   :  { %v261_v35 = vmul.f32 %v259_v34, %v255_v33  ;;  %v810_v34 = vld [vmem:[#allocation2 + $0x98] sm:$0xff] }
 0x17b   :  { %263 = vrot.lane.b32.xlu0 %v261_v35, %s4898_s13 }
 0x1ed   :  { %v264_v37 = vpop.permute.xlu0 %263 }
 0x1ee   :  { %v4993_v38 = vadd.f32 %v264_v37, %v256_v36 }
 0x1f0   :  { %4770 = vtanh.f32 %v4993_v38 }
 0x1fa   :  { %v4771_v47 = vpop.eup %4770 }
 0x1fb   :  { %269 = vrot.lane.b32.xlu1 %v4771_v47, %s4897_s12  ;;  %v814_v47 = vld [vmem:[#allocation2 + $0xb8] sm:$0xff] }
 0x26d   :  { %v270_v48 = vpop.permute.xlu1 %269 }
 0x26e   :  { %v272_v49 = vmul.f32 %v270_v48, %v255_v33  ;;  %v809_v33 = vld [vmem:[#allocation2 + $0x90] sm:$0xff] }
 0x26f   :  { %v5066_v35 = vpack.c.bf16 %v810_v34, %v809_v33 }
 0x270   :  { %274 = vrot.lane.b32.xlu1 %v272_v49, %s4898_s13  ;;  %v5085_v49 = vpack.c.bf16 %v814_v47, %v813_v45 }
 0x2e2   :  { %v275_v55 = vpop.permute.xlu1 %274 }
 0x2e3   :  { %4039 = vmatmul.mubr.msk.f32.vlgmr.msra.gmra.mrb[6].mxu1 %vm49_vm0, %v275_v55  ;;  %4050 = vmatmul.mubr.msk.f32.vlgmr.msra.gmra.mrb[4].mxu0 %vm49_vm0, %v275_v55 }
 0x2e4   :  { %4487 = vmatpush3.bf16.msra.mxu0 %v5016_v52  ;;  %4060 = vmatprep.mubr.msk.f32.mxu0 %vm4895_vm1, %v4896_v19 }
 0x2e5   :  { %4488 = vmatprep.subr.bf16.mxu0 %v4894_v13  ;;  %4493 = vmatpush3.bf16.msra.mxu1 %v4943_v11 }
 0x2e6   :  { %4494 = vmatprep.subr.bf16.mxu1 %v4894_v13  ;;  %4071 = vmatprep.mubr.msk.f32.mxu1 %vm4895_vm1, %v4896_v19 }
 0x2e8   :  { %4490 = vmatpush3.bf16.msra.mxu0 %v5021_v56 }
 0x2e9   :  { %4496 = vmatpush3.bf16.msra.mxu1 %v4960_v18  ;;  %4509 = vmatprep.subr.bf16.mxu0 %v4894_v13 }
 0x2ea   :  { %4497 = vmatprep.subr.bf16.mxu1 %v4894_v13 }
 0x2eb   :  { %4061 = vmatmul.mubr.f32.vlgmr.msra.gmra.mrb[4].mxu0 %v4896_v19 }
 0x2ec   :  { %4104 = vmatprep.mubr.msk.f32.mxu0 %vm4895_vm1, %v4896_v19  ;;  %4511 = vmatpush3.bf16.msra.mxu0 %v5062_v32 }
 0x2ed   :  { %4512 = vmatprep.subr.bf16.mxu0 %v4894_v13 }
 0x2f0   :  { %4514 = vmatpush3.bf16.msra.mxu0 %v5066_v35 }
 0x2f1   :  { %4515 = vmatprep.subr.bf16.mxu0 %v4894_v13 }
 0x3b6   :  { %v344_v60 = vpop.f32.mrb[6].mxu1 }
 0x3b7   :  { %v348_v61 = vadd.f32 %v344_v60, %v146_v59  ;;  %v4040_v62 = vpop.f32.mrb[7].mxu1  ;;  %v5117_v59 = vld [vmem:[%s5590_s2 + $0x2] ss:$0 sm:$0xff] }
 0x3b9   :  { %4772 = vtanh.f32 %v348_v61 }
 0x3be   :  { %v519_v0 = vpop.f32.mrb[4].mxu0 }
 0x3bf   :  { %v4711_v1 = vadd.f32 %v5046_v63, %v519_v0  ;;  %v4062_v2 = vpop.f32.mrb[5].mxu0 }
 0x3c1   :  { %4774 = vtanh.f32 %v4711_v1 }
 0x3c3   :  { %v4773_v3 = vpop.eup %4772 }
 0x3c4   :  { %354 = vrot.lane.b32.xlu0 %v4773_v3, %s4897_s12  ;;  %v350_v5 = vmul.f32 0.5, %v4773_v3 }
 0x3c6   :  { %v351_v6 = vadd.f32 0.5, %v350_v5 }
 0x3c8   :  { %v352_v15 = vmul.f32 %v351_v6, %v4993_v38 }
 0x3cb   :  { %v4775_v4 = vpop.eup %4774 }
 0x3cc   :  { %529 = vrot.lane.b32.xlu1 %v4775_v4, %s4897_s12  ;;  %v525_v9 = vmul.f32 0.5, %v4775_v4 }
 0x3ce   :  { %v526_v10 = vadd.f32 0.5, %v525_v9 }
 0x3d0   :  { %v527_v21 = vmul.f32 0.0, %v526_v10 }
 0x436   :  { %v355_v7 = vpop.permute.xlu0 %354 }
 0x437   :  { %v357_v8 = vmul.f32 %v355_v7, %v351_v6 }
 0x439   :  { %359 = vrot.lane.b32.xlu0 %v357_v8, %s4898_s13 }
 0x43e   :  { %v530_v12 = vpop.permute.xlu1 %529 }
 0x43f   :  { %v532_v14 = vmul.f32 %v530_v12, %v526_v10 }
 0x441   :  { %534 = vrot.lane.b32.xlu1 %v532_v14, %s4898_s13 }
 0x4ab   :  { %v360_v16 = vpop.permute.xlu0 %359 }
 0x4ac   :  { %v5054_v17 = vadd.f32 %v360_v16, %v352_v15 }
 0x4ae   :  { %4776 = vtanh.f32 %v5054_v17 }
 0x4b3   :  { %v535_v23 = vpop.permute.xlu1 %534 }
 0x4b4   :  { %v5057_v26 = vadd.f32 %v535_v23, %v527_v21 }
 0x4b6   :  { %4778 = vtanh.f32 %v5057_v26 }
 0x4b8   :  { %v4777_v28 = vpop.eup %4776 }
 0x4b9   :  { %365 = vrot.lane.b32.xlu0 %v4777_v28, %s4897_s12 }
 0x4c0   :  { %v4779_v29 = vpop.eup %4778 }
 0x4c1   :  { %540 = vrot.lane.b32.xlu1 %v4779_v29, %s4897_s12 }
 0x52b   :  { %v366_v36 = vpop.permute.xlu0 %365 }
 0x52c   :  { %v368_v37 = vmul.f32 %v366_v36, %v351_v6 }
 0x52e   :  { %545 = vrot.lane.b32.xlu0 %v368_v37, %s4898_s13 }
 0x533   :  { %v541_v38 = vpop.permute.xlu1 %540 }
 0x534   :  { %v543_v39 = vmul.f32 %v541_v38, %v526_v10 }
 0x536   :  { %711 = vrot.lane.b32.xlu1 %v543_v39, %s4898_s13 }
 0x5a0   :  { %v546_v40 = vpop.permute.xlu0 %545 }
 0x5a1   :  { %4072 = vmatmul.mubr.msk.f32.vlgmr.msra.gmra.mrb[8].mxu1 %vm49_vm0, %v546_v40 }
 0x5a2   :  { %4499 = vmatpush3.bf16.msra.mxu1 %v4999_v42  ;;  %4082 = vmatprep.mubr.msk.f32.mxu1 %vm4895_vm1, %v4896_v19 }
 0x5a3   :  { %4500 = vmatprep.subr.bf16.mxu1 %v4894_v13 }
 0x5a6   :  { %4502 = vmatpush3.bf16.msra.mxu1 %v5007_v46 }
 0x5a7   :  { %4503 = vmatprep.subr.bf16.mxu1 %v4894_v13 }
 0x5a8   :  { %v712_v48 = vpop.permute.xlu1 %711 }
 0x5a9   :  { %4083 = vmatmul.mubr.msk.f32.vlgmr.msra.gmra.mrb[10].mxu1 %vm49_vm0, %v546_v40  ;;  %4105 = vmatmul.mubr.msk.f32.vlgmr.msra.gmra.mrb[6].mxu0 %vm49_vm0, %v712_v48 }
 0x5aa   :  { %4505 = vmatpush3.bf16.msra.mxu1 %v5016_v52  ;;  %4517 = vmatpush3.bf16.msra.mxu0 %v5078_v44 }
 0x5ab   :  { %4506 = vmatprep.subr.bf16.mxu1 %v4894_v13  ;;  %4518 = vmatprep.subr.bf16.mxu0 %v4894_v13 }
 0x5ac   :  { %4093 = vmatprep.mubr.msk.f32.mxu1 %vm4895_vm1, %v4896_v19  ;;  %4115 = vmatprep.mubr.msk.f32.mxu0 %vm4895_vm1, %v4896_v19 }
 0x5ae   :  { %4508 = vmatpush3.bf16.msra.mxu1 %v5021_v56  ;;  %4520 = vmatpush3.bf16.msra.mxu0 %v5085_v49 }
 0x5af   :  { %4521 = vmatprep.subr.bf16.mxu1 %v4894_v13  ;;  %4527 = vmatprep.subr.bf16.mxu0 %v4894_v13 }
 0x5b1   :  { %4094 = vmatmul.mubr.msk.f32.vlgmr.msra.gmra.mrb[10].mxu1 %vm49_vm0, %v712_v48  ;;  %4116 = vmatmul.mubr.f32.vlgmr.msra.gmra.mrb[6].mxu0 %v4896_v19 }
 0x5b2   :  { %4523 = vmatpush3.bf16.msra.mxu1 %v4943_v11  ;;  %4529 = vmatpush3.bf16.msra.mxu0 %v4999_v42 }
 0x5b3   :  { %4524 = vmatprep.subr.bf16.mxu1 %v4894_v13  ;;  %4530 = vmatprep.subr.bf16.mxu0 %v4894_v13 }
 0x5b4   :  { %4126 = vmatprep.mubr.msk.f32.mxu1 %vm4895_vm1, %v4896_v19  ;;  %4137 = vmatprep.mubr.msk.f32.mxu0 %vm4895_vm1, %v4896_v19 }
 0x5b6   :  { %4526 = vmatpush3.bf16.msra.mxu1 %v4960_v18  ;;  %4532 = vmatpush3.bf16.msra.mxu0 %v5007_v46 }
 0x5b7   :  { %4533 = vmatprep.subr.bf16.mxu0 %v4894_v13  ;;  %4539 = vmatprep.subr.bf16.mxu1 %v4894_v13 }
 0x674   :  { %v615_v51 = vpop.f32.mrb[8].mxu1 }
 0x675   :  { %v619_v53 = vadd.f32 %v615_v51, %v151_v50  ;;  %v4073_v54 = vpop.f32.mrb[9].mxu1 }
 0x677   :  { %4780 = vtanh.f32 %v619_v53  ;;  %v156_v53 = vadd.f32 %v5037_v57, %v4984_v24 }
 0x681   :  { %v4781_v55 = vpop.eup %4780 }
 0x682   :  { %625 = vrot.lane.b32.xlu0 %v4781_v55, %s4897_s12  ;;  %v621_v4 = vmul.f32 0.5, %v4781_v55 }
 0x684   :  { %v781_v60 = vpop.f32.mrb[10].mxu1  ;;  %v956_v61 = vpop.f32.mrb[6].mxu0  ;;  %v622_v5 = vadd.f32 0.5, %v621_v4 }
 0x685   :  { %v4712_v62 = vadd.f32 %v5046_v63, %v781_v60  ;;  %v4095_v0 = vpop.f32.mrb[11].mxu1  ;;  %v4713_v1 = vadd.f32 %v5117_v59, %v956_v61  ;;  %v4117_v58 = vpop.f32.mrb[7].mxu0 }
 0x686   :  { %v623_v23 = vmul.f32 %v622_v5, %v5054_v17 }
 0x687   :  { %4782 = vtanh.f32 %v4712_v62 }
 0x688   :  { %4784 = vtanh.f32 %v4713_v1 }
 0x691   :  { %v4783_v2 = vpop.eup %4782 }
 0x692   :  { %v4785_v3 = vpop.eup %4784  ;;  %791 = vrot.lane.b32.xlu1 %v4783_v2, %s4897_s12  ;;  %v787_v8 = vmul.f32 0.5, %v4783_v2 }
 0x693   :  { %966 = vrot.lane.b32.xlu0 %v4785_v3, %s4897_s12  ;;  %v962_v9 = vmul.f32 0.5, %v4785_v3 }
 0x694   :  { %v788_v10 = vadd.f32 0.5, %v787_v8 }
 0x695   :  { %v963_v14 = vadd.f32 0.5, %v962_v9 }
 0x696   :  { %v789_v31 = vmul.f32 %v788_v10, %v5057_v26 }
 0x697   :  { %v964_v34 = vmul.f32 0.0, %v963_v14 }
 0x6f4   :  { %v626_v6 = vpop.permute.xlu0 %625 }
 0x6f5   :  { %v628_v7 = vmul.f32 %v626_v6, %v622_v5 }
 0x6f7   :  { %630 = vrot.lane.b32.xlu1 %v628_v7, %s4898_s13 }
 0x704   :  { %v792_v12 = vpop.permute.xlu1 %791 }
 0x705   :  { %v794_v15 = vmul.f32 %v792_v12, %v788_v10  ;;  %v967_v16 = vpop.permute.xlu0 %966 }
 0x706   :  { %v969_v21 = vmul.f32 %v967_v16, %v963_v14 }
 0x707   :  { %796 = vrot.lane.b32.xlu0 %v794_v15, %s4898_s13 }
 0x708   :  { %971 = vrot.lane.b32.xlu1 %v969_v21, %s4898_s13 }
 0x769   :  { %v631_v28 = vpop.permute.xlu1 %630 }
 0x76a   :  { %v5127_v29 = vadd.f32 %v631_v28, %v623_v23 }
 0x76c   :  { %4786 = vtanh.f32 %v5127_v29 }
 0x776   :  { %v4787_v30 = vpop.eup %4786 }
 0x777   :  { %636 = vrot.lane.b32.xlu0 %v4787_v30, %s4897_s12 }
 0x779   :  { %v797_v33 = vpop.permute.xlu0 %796 }
 0x77a   :  { %v5132_v36 = vadd.f32 %v797_v33, %v789_v31  ;;  %v972_v37 = vpop.permute.xlu1 %971 }
 0x77b   :  { %v5134_v38 = vadd.f32 %v972_v37, %v964_v34 }
 0x77c   :  { %4788 = vtanh.f32 %v5132_v36 }
 0x77d   :  { %4790 = vtanh.f32 %v5134_v38 }
 0x786   :  { %v4789_v17 = vpop.eup %4788 }
 0x787   :  { %v4791_v39 = vpop.eup %4790  ;;  %802 = vrot.lane.b32.xlu1 %v4789_v17, %s4897_s12 }
 0x788   :  { %977 = vrot.lane.b32.xlu0 %v4791_v39, %s4897_s12 }
 0x7e9   :  { %v637_v40 = vpop.permute.xlu0 %636 }
 0x7ea   :  { %v639_v41 = vmul.f32 %v637_v40, %v622_v5 }
 0x7ec   :  { %982 = vrot.lane.b32.xlu1 %v639_v41, %s4898_s13 }
 0x7f9   :  { %v803_v26 = vpop.permute.xlu1 %802 }
 0x7fa   :  { %v805_v43 = vmul.f32 %v803_v26, %v788_v10  ;;  %v978_v45 = vpop.permute.xlu0 %977 }
 0x7fb   :  { %v5141_v47 = vmul.f32 %v978_v45, %v963_v14 }
 0x7fc   :  { %1148 = vrot.lane.b32.xlu0 %v805_v43, %s4898_s13 }
 0x7fd   :  { %1314 = vrot.lane.b32.xlu1 %v5141_v47, %s4898_s13 }
 0x85e   :  { %v983_v48 = vpop.permute.xlu1 %982 }
 0x85f   :  { %4127 = vmatmul.mubr.msk.f32.vlgmr.msra.gmra.mrb[12].mxu1 %vm49_vm0, %v983_v48  ;;  %4138 = vmatmul.mubr.msk.f32.vlgmr.msra.gmra.mrb[8].mxu0 %vm49_vm0, %v983_v48 }
 0x860   :  { %4535 = vmatpush3.bf16.msra.mxu0 %v5016_v52  ;;  %4541 = vmatpush3.bf16.msra.mxu1 %v5062_v32 }
 0x861   :  { %4536 = vmatprep.subr.bf16.mxu0 %v4894_v13  ;;  %4542 = vmatprep.subr.bf16.mxu1 %v4894_v13 }
 0x862   :  { %4148 = vmatprep.mubr.msk.f32.mxu0 %vm4895_vm1, %v4896_v19  ;;  %4159 = vmatprep.mubr.msk.f32.mxu1 %vm4895_vm1, %v4896_v19 }
 0x864   :  { %4538 = vmatpush3.bf16.msra.mxu0 %v5021_v56  ;;  %4544 = vmatpush3.bf16.msra.mxu1 %v5066_v35 }
 0x865   :  { %4545 = vmatprep.subr.bf16.mxu1 %v4894_v13  ;;  %4551 = vmatprep.subr.bf16.mxu0 %v4894_v13 }
 0x86e   :  { %v1149_v50 = vpop.permute.xlu0 %1148 }
 0x86f   :  { %4149 = vmatmul.mubr.msk.f32.vlgmr.msra.gmra.mrb[8].mxu0 %vm49_vm0, %v1149_v50  ;;  %4160 = vmatmul.mubr.msk.f32.vlgmr.msra.gmra.mrb[14].mxu1 %vm49_vm0, %v1149_v50  ;;  %v1315_v51 = vpop.permute.xlu1 %1314 }
 0x870   :  { %4547 = vmatpush3.bf16.msra.mxu1 %v5078_v44  ;;  %4170 = vmatprep.mubr.msk.f32.mxu1 %vm4895_vm1, %v4896_v19 }
 0x871   :  { %4548 = vmatprep.subr.bf16.mxu1 %v4894_v13  ;;  %4553 = vmatpush3.bf16.msra.mxu0 %v4943_v11 }
 0x872   :  { %4554 = vmatprep.subr.bf16.mxu0 %v4894_v13  ;;  %4181 = vmatprep.mubr.msk.f32.mxu0 %vm4895_vm1, %v4896_v19 }
 0x874   :  { %4550 = vmatpush3.bf16.msra.mxu1 %v5085_v49 }
 0x875   :  { %4557 = vmatprep.subr.bf16.mxu1 %v4894_v13  ;;  %4556 = vmatpush3.bf16.msra.mxu0 %v4960_v18 }
 0x876   :  { %4569 = vmatprep.subr.bf16.mxu0 %v4894_v13 }
 0x877   :  { %4171 = vmatmul.mubr.msk.f32.vlgmr.msra.gmra.mrb[14].mxu1 %vm49_vm0, %v1315_v51 }
 0x878   :  { %4559 = vmatpush3.bf16.msra.mxu1 %v4999_v42  ;;  %4192 = vmatprep.mubr.msk.f32.mxu1 %vm4895_vm1, %v4896_v19 }
 0x879   :  { %4560 = vmatprep.subr.bf16.mxu1 %v4894_v13 }
 0x87c   :  { %4562 = vmatpush3.bf16.msra.mxu1 %v5007_v46 }
 0x87d   :  { %4563 = vmatprep.subr.bf16.mxu1 %v4894_v13 }
 0x932   :  { %v1052_v54 = vpop.f32.mrb[12].mxu1 }
 0x933   :  { %v1056_v55 = vadd.f32 %v1052_v54, %v156_v53  ;;  %v4128_v60 = vpop.f32.mrb[13].mxu1 }
 0x935   :  { %4792 = vtanh.f32 %v1056_v55  ;;  %v161_v55 = vadd.f32 %v4984_v24, %v4979_v22 }
 0x93f   :  { %v4793_v61 = vpop.eup %4792 }
 0x940   :  { %1062 = vrot.lane.b32.xlu0 %v4793_v61, %s4897_s12  ;;  %v1058_v5 = vmul.f32 0.5, %v4793_v61 }
 0x942   :  { %v1218_v62 = vpop.f32.mrb[8].mxu0  ;;  %v1059_v6 = vadd.f32 0.5, %v1058_v5 }
 0x943   :  { %v4714_v0 = vadd.f32 %v5046_v63, %v1218_v62  ;;  %v4150_v1 = vpop.f32.mrb[9].mxu0 }
 0x944   :  { %v1060_v28 = vmul.f32 %v1059_v6, %v5127_v29 }
 0x945   :  { %4794 = vtanh.f32 %v4714_v0 }
 0x94a   :  { %v1384_v58 = vpop.f32.mrb[14].mxu1 }
 0x94b   :  { %v4715_v2 = vadd.f32 %v5117_v59, %v1384_v58  ;;  %v4172_v3 = vpop.f32.mrb[15].mxu1 }
 0x94d   :  { %4796 = vtanh.f32 %v4715_v2 }
 0x94f   :  { %v4795_v4 = vpop.eup %4794 }
 0x950   :  { %1228 = vrot.lane.b32.xlu1 %v4795_v4, %s4897_s12  ;;  %v1224_v9 = vmul.f32 0.5, %v4795_v4 }
 0x952   :  { %v1225_v10 = vadd.f32 0.5, %v1224_v9 }
 0x954   :  { %v1226_v34 = vmul.f32 %v1225_v10, %v5132_v36 }
 0x957   :  { %v4797_v57 = vpop.eup %4796 }
 0x958   :  { %1394 = vrot.lane.b32.xlu0 %v4797_v57, %s4897_s12  ;;  %v1390_v15 = vmul.f32 0.5, %v4797_v57 }
 0x95a   :  { %v1391_v16 = vadd.f32 0.5, %v1390_v15 }
 0x95c   :  { %v1392_v39 = vmul.f32 %v1391_v16, %v5134_v38 }
 0x9b2   :  { %v1063_v7 = vpop.permute.xlu0 %1062 }
 0x9b3   :  { %v1065_v8 = vmul.f32 %v1063_v7, %v1059_v6 }
 0x9b5   :  { %1067 = vrot.lane.b32.xlu1 %v1065_v8, %s4898_s13 }
 0x9c2   :  { %v1229_v12 = vpop.permute.xlu1 %1228 }
 0x9c3   :  { %v1231_v14 = vmul.f32 %v1229_v12, %v1225_v10 }
 0x9c5   :  { %1233 = vrot.lane.b32.xlu0 %v1231_v14, %s4898_s13 }
 0x9ca   :  { %v1395_v21 = vpop.permute.xlu0 %1394 }
 0x9cb   :  { %v1397_v23 = vmul.f32 %v1395_v21, %v1391_v16 }
 0x9cd   :  { %1399 = vrot.lane.b32.xlu1 %v1397_v23, %s4898_s13 }
 0xa27   :  { %v1068_v30 = vpop.permute.xlu1 %1067 }
 0xa28   :  { %v5192_v31 = vadd.f32 %v1068_v30, %v1060_v28 }
 0xa2a   :  { %4798 = vtanh.f32 %v5192_v31 }
 0xa34   :  { %v4799_v33 = vpop.eup %4798 }
 0xa35   :  { %1073 = vrot.lane.b32.xlu0 %v4799_v33, %s4897_s12 }
 0xa37   :  { %v1234_v37 = vpop.permute.xlu0 %1233 }
 0xa38   :  { %v5197_v17 = vadd.f32 %v1234_v37, %v1226_v34 }
 0xa3a   :  { %4800 = vtanh.f32 %v5197_v17 }
 0xa3f   :  { %v1400_v40 = vpop.permute.xlu1 %1399 }
 0xa40   :  { %v5201_v41 = vadd.f32 %v1400_v40, %v1392_v39 }
 0xa42   :  { %4802 = vtanh.f32 %v5201_v41 }
 0xa44   :  { %v4801_v29 = vpop.eup %4800 }
 0xa45   :  { %1239 = vrot.lane.b32.xlu1 %v4801_v29, %s4897_s12 }
 0xa4c   :  { %v4803_v26 = vpop.eup %4802 }
 0xa4d   :  { %1405 = vrot.lane.b32.xlu0 %v4803_v26, %s4897_s12 }
 0xaa7   :  { %v1074_v43 = vpop.permute.xlu0 %1073 }
 0xaa8   :  { %v1076_v36 = vmul.f32 %v1074_v43, %v1059_v6 }
 0xaaa   :  { %1410 = vrot.lane.b32.xlu1 %v1076_v36, %s4898_s13 }
 0xab7   :  { %v1240_v45 = vpop.permute.xlu1 %1239 }
 0xab8   :  { %v1242_v48 = vmul.f32 %v1240_v45, %v1225_v10 }
 0xaba   :  { %1576 = vrot.lane.b32.xlu0 %v1242_v48, %s4898_s13 }
 0xabf   :  { %v1406_v38 = vpop.permute.xlu0 %1405 }
 0xac0   :  { %v5208_v50 = vmul.f32 %v1406_v38, %v1391_v16 }
 0xac2   :  { %1742 = vrot.lane.b32.xlu1 %v5208_v50, %s4898_s13 }
 0xb1c   :  { %v1411_v51 = vpop.permute.xlu1 %1410 }
 0xb1d   :  { %4182 = vmatmul.mubr.msk.f32.vlgmr.msra.gmra.mrb[10].mxu0 %vm49_vm0, %v1411_v51  ;;  %4193 = vmatmul.mubr.msk.f32.vlgmr.msra.gmra.mrb[16].mxu1 %vm49_vm0, %v1411_v51 }
 0xb1e   :  { %4565 = vmatpush3.bf16.msra.mxu1 %v5016_v52  ;;  %4571 = vmatpush3.bf16.msra.mxu0 %v5062_v32 }
 0xb1f   :  { %4566 = vmatprep.subr.bf16.mxu1 %v4894_v13  ;;  %4572 = vmatprep.subr.bf16.mxu0 %v4894_v13 }
 0xb20   :  { %4203 = vmatprep.mubr.msk.f32.mxu1 %vm4895_vm1, %v4896_v19  ;;  %4214 = vmatprep.mubr.msk.f32.mxu0 %vm4895_vm1, %v4896_v19 }
 0xb22   :  { %4568 = vmatpush3.bf16.msra.mxu1 %v5021_v56  ;;  %4574 = vmatpush3.bf16.msra.mxu0 %v5066_v35 }
 0xb23   :  { %4575 = vmatprep.subr.bf16.mxu0 %v4894_v13  ;;  %4581 = vmatprep.subr.bf16.mxu1 %v4894_v13 }
 0xb2c   :  { %v1577_v53 = vpop.permute.xlu0 %1576 }
 0xb2d   :  { %4204 = vmatmul.mubr.msk.f32.vlgmr.msra.gmra.mrb[16].mxu1 %vm49_vm0, %v1577_v53  ;;  %4215 = vmatmul.mubr.msk.f32.vlgmr.msra.gmra.mrb[12].mxu0 %vm49_vm0, %v1577_v53 }
 0xb2e   :  { %4577 = vmatpush3.bf16.msra.mxu0 %v5078_v44  ;;  %4225 = vmatprep.mubr.msk.f32.mxu0 %vm4895_vm1, %v4896_v19 }
 0xb2f   :  { %4578 = vmatprep.subr.bf16.mxu0 %v4894_v13  ;;  %4583 = vmatpush3.bf16.msra.mxu1 %v4943_v11 }
 0xb30   :  { %4584 = vmatprep.subr.bf16.mxu1 %v4894_v13  ;;  %4236 = vmatprep.mubr.msk.f32.mxu1 %vm4895_vm1, %v4896_v19 }
 0xb32   :  { %4580 = vmatpush3.bf16.msra.mxu0 %v5085_v49 }
 0xb33   :  { %4587 = vmatprep.subr.bf16.mxu0 %v4894_v13  ;;  %4586 = vmatpush3.bf16.msra.mxu1 %v4960_v18 }
 0xb34   :  { %v1743_v54 = vpop.permute.xlu1 %1742  ;;  %4599 = vmatprep.subr.bf16.mxu1 %v4894_v13 }
 0xb35   :  { %4226 = vmatmul.mubr.msk.f32.vlgmr.msra.gmra.mrb[12].mxu0 %vm49_vm0, %v1743_v54 }
 0xb36   :  { %4589 = vmatpush3.bf16.msra.mxu0 %v4999_v42  ;;  %4247 = vmatprep.mubr.msk.f32.mxu0 %vm4895_vm1, %v4896_v19 }
 0xb37   :  { %4590 = vmatprep.subr.bf16.mxu0 %v4894_v13 }
 0xb3a   :  { %4592 = vmatpush3.bf16.msra.mxu0 %v5007_v46 }
 0xb3b   :  { %4593 = vmatprep.subr.bf16.mxu0 %v4894_v13 }
 0xbf0   :  { %v1480_v60 = vpop.f32.mrb[10].mxu0 }
 0xbf1   :  { %v1484_v61 = vadd.f32 %v1480_v60, %v161_v55  ;;  %v4183_v62 = vpop.f32.mrb[11].mxu0 }
 0xbf3   :  { %4804 = vtanh.f32 %v1484_v61  ;;  %v166_v61 = vadd.f32 %v4975_v20, %v4984_v24 }
 0xbfd   :  { %v4805_v0 = vpop.eup %4804 }
 0xbfe   :  { %1490 = vrot.lane.b32.xlu0 %v4805_v0, %s4897_s12  ;;  %v1486_v6 = vmul.f32 0.5, %v4805_v0 }
 0xc00   :  { %v1646_v1 = vpop.f32.mrb[16].mxu1  ;;  %v1487_v7 = vadd.f32 0.5, %v1486_v6 }
 0xc01   :  { %v4716_v58 = vadd.f32 %v5046_v63, %v1646_v1  ;;  %v4205_v2 = vpop.f32.mrb[17].mxu1 }
 0xc02   :  { %v1488_v30 = vmul.f32 %v1487_v7, %v5192_v31 }
 0xc03   :  { %4806 = vtanh.f32 %v4716_v58 }
 0xc08   :  { %v1812_v3 = vpop.f32.mrb[12].mxu0 }
 0xc09   :  { %v4717_v4 = vadd.f32 %v5117_v59, %v1812_v3  ;;  %v4227_v57 = vpop.f32.mrb[13].mxu0 }
 0xc0b   :  { %4808 = vtanh.f32 %v4717_v4 }
 0xc0d   :  { %v4807_v5 = vpop.eup %4806 }
 0xc0e   :  { %1656 = vrot.lane.b32.xlu1 %v4807_v5, %s4897_s12  ;;  %v1652_v10 = vmul.f32 0.5, %v4807_v5 }
 0xc10   :  { %v1653_v12 = vadd.f32 0.5, %v1652_v10 }
 0xc12   :  { %v1654_v39 = vmul.f32 %v1653_v12, %v5197_v17 }
 0xc15   :  { %v4809_v22 = vpop.eup %4808 }
 0xc16   :  { %1822 = vrot.lane.b32.xlu0 %v4809_v22, %s4897_s12  ;;  %v1818_v16 = vmul.f32 0.5, %v4809_v22 }
 0xc18   :  { %v1819_v21 = vadd.f32 0.5, %v1818_v16 }
 0xc1a   :  { %v1820_v26 = vmul.f32 %v1819_v21, %v5201_v41 }
 0xc70   :  { %v1491_v8 = vpop.permute.xlu0 %1490 }
 0xc71   :  { %v1493_v9 = vmul.f32 %v1491_v8, %v1487_v7 }
 0xc73   :  { %1495 = vrot.lane.b32.xlu1 %v1493_v9, %s4898_s13 }
 0xc80   :  { %v1657_v14 = vpop.permute.xlu1 %1656 }
 0xc81   :  { %v1659_v15 = vmul.f32 %v1657_v14, %v1653_v12 }
 0xc83   :  { %1661 = vrot.lane.b32.xlu0 %v1659_v15, %s4898_s13 }
 0xc88   :  { %v1823_v23 = vpop.permute.xlu0 %1822 }
 0xc89   :  { %v1825_v28 = vmul.f32 %v1823_v23, %v1819_v21 }
 0xc8b   :  { %1827 = vrot.lane.b32.xlu1 %v1825_v28, %s4898_s13 }
 0xce5   :  { %v1496_v33 = vpop.permute.xlu1 %1495 }
 0xce6   :  { %v5258_v34 = vadd.f32 %v1496_v33, %v1488_v30 }
 0xce8   :  { %4810 = vtanh.f32 %v5258_v34 }
 0xcf2   :  { %v4811_v37 = vpop.eup %4810 }
 0xcf3   :  { %1501 = vrot.lane.b32.xlu0 %v4811_v37, %s4897_s12 }
 0xcf5   :  { %v1662_v40 = vpop.permute.xlu0 %1661 }
 0xcf6   :  { %v5263_v29 = vadd.f32 %v1662_v40, %v1654_v39 }
 0xcf8   :  { %4812 = vtanh.f32 %v5263_v29 }
 0xcfd   :  { %v1828_v43 = vpop.permute.xlu1 %1827 }
 0xcfe   :  { %v5267_v36 = vadd.f32 %v1828_v43, %v1820_v26 }
 0xd00   :  { %4814 = vtanh.f32 %v5267_v36 }
 0xd02   :  { %v4813_v31 = vpop.eup %4812 }
 0xd03   :  { %1667 = vrot.lane.b32.xlu1 %v4813_v31, %s4897_s12 }
 0xd0a   :  { %v4815_v45 = vpop.eup %4814 }
 0xd0b   :  { %1833 = vrot.lane.b32.xlu0 %v4815_v45, %s4897_s12 }
 0xd65   :  { %v1502_v48 = vpop.permute.xlu0 %1501 }
 0xd66   :  { %v1504_v17 = vmul.f32 %v1502_v48, %v1487_v7 }
 0xd68   :  { %1838 = vrot.lane.b32.xlu1 %v1504_v17, %s4898_s13 }
 0xd75   :  { %v1668_v38 = vpop.permute.xlu1 %1667 }
 0xd76   :  { %v1670_v51 = vmul.f32 %v1668_v38, %v1653_v12 }
 0xd78   :  { %2004 = vrot.lane.b32.xlu0 %v1670_v51, %s4898_s13 }
 0xd7d   :  { %v1834_v41 = vpop.permute.xlu0 %1833 }
 0xd7e   :  { %v5274_v53 = vmul.f32 %v1834_v41, %v1819_v21 }
 0xd80   :  { %2170 = vrot.lane.b32.xlu1 %v5274_v53, %s4898_s13 }
 0xdda   :  { %v1839_v54 = vpop.permute.xlu1 %1838 }
 0xddb   :  { %4237 = vmatmul.mubr.msk.f32.vlgmr.msra.gmra.mrb[18].mxu1 %vm49_vm0, %v1839_v54  ;;  %4248 = vmatmul.mubr.msk.f32.vlgmr.msra.gmra.mrb[14].mxu0 %vm49_vm0, %v1839_v54 }
 0xddc   :  { %4595 = vmatpush3.bf16.msra.mxu0 %v5016_v52  ;;  %4601 = vmatpush3.bf16.msra.mxu1 %v5062_v32 }
 0xddd   :  { %4596 = vmatprep.subr.bf16.mxu0 %v4894_v13  ;;  %4602 = vmatprep.subr.bf16.mxu1 %v4894_v13 }
 0xdde   :  { %4258 = vmatprep.mubr.msk.f32.mxu0 %vm4895_vm1, %v4896_v19  ;;  %4269 = vmatprep.mubr.msk.f32.mxu1 %vm4895_vm1, %v4896_v19 }
 0xde0   :  { %4598 = vmatpush3.bf16.msra.mxu0 %v5021_v56  ;;  %4604 = vmatpush3.bf16.msra.mxu1 %v5066_v35 }
 0xde1   :  { %4605 = vmatprep.subr.bf16.mxu1 %v4894_v13  ;;  %4611 = vmatprep.subr.bf16.mxu0 %v4894_v13 }
 0xdea   :  { %v2005_v55 = vpop.permute.xlu0 %2004 }
 0xdeb   :  { %4259 = vmatmul.mubr.msk.f32.vlgmr.msra.gmra.mrb[14].mxu0 %vm49_vm0, %v2005_v55  ;;  %4270 = vmatmul.mubr.msk.f32.vlgmr.msra.gmra.mrb[20].mxu1 %vm49_vm0, %v2005_v55 }
 0xdec   :  { %4607 = vmatpush3.bf16.msra.mxu1 %v5078_v44  ;;  %4280 = vmatprep.mubr.msk.f32.mxu1 %vm4895_vm1, %v4896_v19 }
 0xded   :  { %4608 = vmatprep.subr.bf16.mxu1 %v4894_v13  ;;  %4613 = vmatpush3.bf16.msra.mxu0 %v4943_v11 }
 0xdee   :  { %4614 = vmatprep.subr.bf16.mxu0 %v4894_v13  ;;  %4291 = vmatprep.mubr.msk.f32.mxu0 %vm4895_vm1, %v4896_v19 }
 0xdf0   :  { %4610 = vmatpush3.bf16.msra.mxu1 %v5085_v49 }
 0xdf1   :  { %4617 = vmatprep.subr.bf16.mxu1 %v4894_v13  ;;  %4616 = vmatpush3.bf16.msra.mxu0 %v4960_v18 }
 0xdf2   :  { %v2171_v60 = vpop.permute.xlu1 %2170  ;;  %4629 = vmatprep.subr.bf16.mxu0 %v4894_v13 }
 0xdf3   :  { %4281 = vmatmul.mubr.msk.f32.vlgmr.msra.gmra.mrb[20].mxu1 %vm49_vm0, %v2171_v60 }
 0xdf4   :  { %4619 = vmatpush3.bf16.msra.mxu1 %v4999_v42  ;;  %4302 = vmatprep.mubr.msk.f32.mxu1 %vm4895_vm1, %v4896_v19 }
 0xdf5   :  { %4620 = vmatprep.subr.bf16.mxu1 %v4894_v13 }
 0xdf8   :  { %4622 = vmatpush3.bf16.msra.mxu1 %v5007_v46 }
 0xdf9   :  { %4623 = vmatprep.subr.bf16.mxu1 %v4894_v13 }
 0xeae   :  { %v1908_v62 = vpop.f32.mrb[18].mxu1 }
 0xeaf   :  { %v1912_v0 = vadd.f32 %v1908_v62, %v166_v61  ;;  %v4238_v1 = vpop.f32.mrb[19].mxu1 }
 0xeb1   :  { %4816 = vtanh.f32 %v1912_v0 }
 0xebb   :  { %v4817_v58 = vpop.eup %4816 }
 0xebc   :  { %1918 = vrot.lane.b32.xlu0 %v4817_v58, %s4897_s12  ;;  %v1914_v24 = vmul.f32 0.5, %v4817_v58 }
 0xebe   :  { %v2074_v2 = vpop.f32.mrb[14].mxu0  ;;  %v1915_v7 = vadd.f32 0.5, %v1914_v24 }
 0xebf   :  { %v4718_v3 = vadd.f32 %v5046_v63, %v2074_v2  ;;  %v4260_v4 = vpop.f32.mrb[15].mxu0 }
 0xec0   :  { %v1916_v30 = vmul.f32 %v1915_v7, %v5258_v34 }
 0xec1   :  { %4818 = vtanh.f32 %v4718_v3 }
 0xec6   :  { %v2240_v57 = vpop.f32.mrb[20].mxu1 }
 0xec7   :  { %v4719_v5 = vadd.f32 %v5117_v59, %v2240_v57  ;;  %v4282_v22 = vpop.f32.mrb[21].mxu1 }
 0xec9   :  { %4820 = vtanh.f32 %v4719_v5 }
 0xecb   :  { %v4819_v6 = vpop.eup %4818 }
 0xecc   :  { %2084 = vrot.lane.b32.xlu1 %v4819_v6, %s4897_s12  ;;  %v2080_v10 = vmul.f32 0.5, %v4819_v6 }
 0xece   :  { %v2081_v12 = vadd.f32 0.5, %v2080_v10 }
 0xed0   :  { %v2082_v40 = vmul.f32 %v2081_v12, %v5263_v29 }
 0xed3   :  { %v4821_v20 = vpop.eup %4820 }
 0xed4   :  { %2250 = vrot.lane.b32.xlu0 %v4821_v20, %s4897_s12  ;;  %v2246_v16 = vmul.f32 0.5, %v4821_v20 }
 0xed6   :  { %v2247_v21 = vadd.f32 0.5, %v2246_v16 }
 0xed8   :  { %v2248_v31 = vmul.f32 %v2247_v21, %v5267_v36 }
 0xf2e   :  { %v1919_v8 = vpop.permute.xlu0 %1918 }
 0xf2f   :  { %v1921_v9 = vmul.f32 %v1919_v8, %v1915_v7 }
 0xf31   :  { %1923 = vrot.lane.b32.xlu1 %v1921_v9, %s4898_s13 }
 0xf3e   :  { %v2085_v14 = vpop.permute.xlu1 %2084 }
 0xf3f   :  { %v2087_v15 = vmul.f32 %v2085_v14, %v2081_v12 }
 0xf41   :  { %2089 = vrot.lane.b32.xlu0 %v2087_v15, %s4898_s13 }
 0xf46   :  { %v2251_v23 = vpop.permute.xlu0 %2250 }
 0xf47   :  { %v2253_v28 = vmul.f32 %v2251_v23, %v2247_v21 }
 0xf49   :  { %2255 = vrot.lane.b32.xlu1 %v2253_v28, %s4898_s13 }
 0xfa3   :  { %v1924_v33 = vpop.permute.xlu1 %1923 }
 0xfa4   :  { %v5324_v37 = vadd.f32 %v1924_v33, %v1916_v30 }
 0xfa6   :  { %4822 = vtanh.f32 %v5324_v37 }
 0xfb0   :  { %v4823_v39 = vpop.eup %4822 }
 0xfb1   :  { %1929 = vrot.lane.b32.xlu0 %v4823_v39, %s4897_s12 }
 0xfb3   :  { %v2090_v26 = vpop.permute.xlu0 %2089 }
 0xfb4   :  { %v5329_v43 = vadd.f32 %v2090_v26, %v2082_v40 }
 0xfb6   :  { %4824 = vtanh.f32 %v5329_v43 }
 0xfbb   :  { %v2256_v45 = vpop.permute.xlu1 %2255 }
 0xfbc   :  { %v5333_v48 = vadd.f32 %v2256_v45, %v2248_v31 }
 0xfbe   :  { %4826 = vtanh.f32 %v5333_v48 }
 0xfc0   :  { %v4825_v34 = vpop.eup %4824 }
 0xfc1   :  { %2095 = vrot.lane.b32.xlu1 %v4825_v34, %s4897_s12 }
 0xfc8   :  { %v4827_v17 = vpop.eup %4826 }
 0xfc9   :  { %2261 = vrot.lane.b32.xlu0 %v4827_v17, %s4897_s12 }
0x1023   :  { %v1930_v38 = vpop.permute.xlu0 %1929 }
0x1024   :  { %v1932_v29 = vmul.f32 %v1930_v38, %v1915_v7 }
0x1026   :  { %2266 = vrot.lane.b32.xlu1 %v1932_v29, %s4898_s13 }
0x1033   :  { %v2096_v51 = vpop.permute.xlu1 %2095 }
0x1034   :  { %v2098_v41 = vmul.f32 %v2096_v51, %v2081_v12 }
0x1036   :  { %2432 = vrot.lane.b32.xlu0 %v2098_v41, %s4898_s13 }
0x103b   :  { %v2262_v36 = vpop.permute.xlu0 %2261 }
0x103c   :  { %v5340_v54 = vmul.f32 %v2262_v36, %v2247_v21 }
0x103e   :  { %2598 = vrot.lane.b32.xlu1 %v5340_v54, %s4898_s13 }
0x1098   :  { %v2267_v55 = vpop.permute.xlu1 %2266 }
0x1099   :  { %4292 = vmatmul.mubr.msk.f32.vlgmr.msra.gmra.mrb[16].mxu0 %vm49_vm0, %v2267_v55  ;;  %4303 = vmatmul.mubr.msk.f32.vlgmr.msra.gmra.mrb[22].mxu1 %vm49_vm0, %v2267_v55 }
0x109a   :  { %4625 = vmatpush3.bf16.msra.mxu1 %v5016_v52  ;;  %4631 = vmatpush3.bf16.msra.mxu0 %v5062_v32 }
0x109b   :  { %4626 = vmatprep.subr.bf16.mxu1 %v4894_v13  ;;  %4632 = vmatprep.subr.bf16.mxu0 %v4894_v13 }
0x109c   :  { %4313 = vmatprep.mubr.msk.f32.mxu1 %vm4895_vm1, %v4896_v19  ;;  %4324 = vmatprep.mubr.msk.f32.mxu0 %vm4895_vm1, %v4896_v19 }
0x109e   :  { %4628 = vmatpush3.bf16.msra.mxu1 %v5021_v56  ;;  %4634 = vmatpush3.bf16.msra.mxu0 %v5066_v35 }
0x109f   :  { %4635 = vmatprep.subr.bf16.mxu0 %v4894_v13  ;;  %4641 = vmatprep.subr.bf16.mxu1 %v4894_v13 }
0x10a8   :  { %v2433_v60 = vpop.permute.xlu0 %2432 }
0x10a9   :  { %4314 = vmatmul.mubr.msk.f32.vlgmr.msra.gmra.mrb[22].mxu1 %vm49_vm0, %v2433_v60  ;;  %4325 = vmatmul.mubr.msk.f32.vlgmr.msra.gmra.mrb[18].mxu0 %vm49_vm0, %v2433_v60 }
0x10aa   :  { %4637 = vmatpush3.bf16.msra.mxu0 %v5078_v44  ;;  %4335 = vmatprep.mubr.msk.f32.mxu0 %vm4895_vm1, %v4896_v19 }
0x10ab   :  { %4638 = vmatprep.subr.bf16.mxu0 %v4894_v13  ;;  %4643 = vmatpush3.bf16.msra.mxu1 %v4943_v11  ;;  %v5382_v11 = vld [vmem:[%s5590_s2] ss:$0 sm:$0xff] }
0x10ac   :  { %4644 = vmatprep.subr.bf16.mxu1 %v4894_v13  ;;  %4346 = vmatprep.mubr.msk.f32.mxu1 %vm4895_vm1, %v4896_v19 }
0x10ae   :  { %4640 = vmatpush3.bf16.msra.mxu0 %v5085_v49 }
0x10af   :  { %4647 = vmatprep.subr.bf16.mxu0 %v4894_v13  ;;  %4646 = vmatpush3.bf16.msra.mxu1 %v4960_v18  ;;  %v171_v18 = vadd.f32 %v5382_v11, %v4989_v27 }
0x10b0   :  { %v2599_v61 = vpop.permute.xlu1 %2598  ;;  %4659 = vmatprep.subr.bf16.mxu1 %v4894_v13 }
0x10b1   :  { %4336 = vmatmul.mubr.msk.f32.vlgmr.msra.gmra.mrb[18].mxu0 %vm49_vm0, %v2599_v61 }
0x10b2   :  { %4649 = vmatpush3.bf16.msra.mxu0 %v4999_v42  ;;  %4357 = vmatprep.mubr.msk.f32.mxu0 %vm4895_vm1, %v4896_v19 }
0x10b3   :  { %4650 = vmatprep.subr.bf16.mxu0 %v4894_v13 }
0x10b6   :  { %4652 = vmatpush3.bf16.msra.mxu0 %v5007_v46 }
0x10b7   :  { %4653 = vmatprep.subr.bf16.mxu0 %v4894_v13 }
0x116c   :  { %v2336_v62 = vpop.f32.mrb[16].mxu0 }
0x116d   :  { %v2340_v0 = vadd.f32 %v2336_v62, %v171_v18  ;;  %v4293_v1 = vpop.f32.mrb[17].mxu0 }
0x116e   :  { %v5456_v1 = vld [vmem:[%s5590_s2 + $0x1] ss:$0 sm:$0xff] }
0x116f   :  { %4828 = vtanh.f32 %v2340_v0 }
0x1179   :  { %v4829_v58 = vpop.eup %4828 }
0x117a   :  { %2346 = vrot.lane.b32.xlu0 %v4829_v58, %s4897_s12  ;;  %v2342_v20 = vmul.f32 0.5, %v4829_v58 }
0x117c   :  { %v2502_v2 = vpop.f32.mrb[22].mxu1  ;;  %v2343_v24 = vadd.f32 0.5, %v2342_v20 }
0x117d   :  { %v4720_v3 = vadd.f32 %v5046_v63, %v2502_v2  ;;  %v4315_v4 = vpop.f32.mrb[23].mxu1 }
0x117e   :  { %v2344_v23 = vmul.f32 %v2343_v24, %v5324_v37 }
0x117f   :  { %4830 = vtanh.f32 %v4720_v3 }
0x1184   :  { %v2668_v57 = vpop.f32.mrb[18].mxu0 }
0x1185   :  { %v4721_v5 = vadd.f32 %v5117_v59, %v2668_v57  ;;  %v4337_v22 = vpop.f32.mrb[19].mxu0 }
0x1187   :  { %4832 = vtanh.f32 %v4721_v5 }
0x1189   :  { %v4831_v6 = vpop.eup %4830 }
0x118a   :  { %2512 = vrot.lane.b32.xlu1 %v4831_v6, %s4897_s12  ;;  %v2508_v63 = vmul.f32 0.5, %v4831_v6 }
0x118c   :  { %v2509_v9 = vadd.f32 0.5, %v2508_v63 }
0x118e   :  { %v2510_v39 = vmul.f32 %v2509_v9, %v5329_v43 }
0x1191   :  { %v4833_v27 = vpop.eup %4832 }
0x1192   :  { %2678 = vrot.lane.b32.xlu0 %v4833_v27, %s4897_s12  ;;  %v2674_v14 = vmul.f32 0.5, %v4833_v27 }
0x1194   :  { %v2675_v15 = vadd.f32 0.5, %v2674_v14 }
0x1196   :  { %v2676_v31 = vmul.f32 %v2675_v15, %v5333_v48 }
0x11ec   :  { %v2347_v7 = vpop.permute.xlu0 %2346 }
0x11ed   :  { %v2349_v8 = vmul.f32 %v2347_v7, %v2343_v24 }
0x11ef   :  { %2351 = vrot.lane.b32.xlu1 %v2349_v8, %s4898_s13 }
0x11fc   :  { %v2513_v10 = vpop.permute.xlu1 %2512 }
0x11fd   :  { %v2515_v12 = vmul.f32 %v2513_v10, %v2509_v9 }
0x11ff   :  { %2517 = vrot.lane.b32.xlu0 %v2515_v12, %s4898_s13 }
0x1204   :  { %v2679_v16 = vpop.permute.xlu0 %2678 }
0x1205   :  { %v2681_v21 = vmul.f32 %v2679_v16, %v2675_v15 }
0x1207   :  { %2683 = vrot.lane.b32.xlu1 %v2681_v21, %s4898_s13 }
0x1261   :  { %v2352_v28 = vpop.permute.xlu1 %2351 }
0x1262   :  { %v5395_v30 = vadd.f32 %v2352_v28, %v2344_v23 }
0x1264   :  { %4834 = vtanh.f32 %v5395_v30 }
0x126e   :  { %v4835_v33 = vpop.eup %4834 }
0x126f   :  { %2357 = vrot.lane.b32.xlu0 %v4835_v33, %s4897_s12 }
0x1271   :  { %v2518_v40 = vpop.permute.xlu0 %2517 }
0x1272   :  { %v5400_v26 = vadd.f32 %v2518_v40, %v2510_v39 }
0x1274   :  { %4836 = vtanh.f32 %v5400_v26 }
0x1279   :  { %v2684_v45 = vpop.permute.xlu1 %2683 }
0x127a   :  { %v5404_v34 = vadd.f32 %v2684_v45, %v2676_v31 }
0x127c   :  { %4838 = vtanh.f32 %v5404_v34 }
0x127e   :  { %v4837_v37 = vpop.eup %4836 }
0x127f   :  { %2523 = vrot.lane.b32.xlu1 %v4837_v37, %s4897_s12 }
0x1286   :  { %v4839_v17 = vpop.eup %4838 }
0x1287   :  { %2689 = vrot.lane.b32.xlu0 %v4839_v17, %s4897_s12 }
0x12e1   :  { %v2358_v38 = vpop.permute.xlu0 %2357 }
0x12e2   :  { %v2360_v43 = vmul.f32 %v2358_v38, %v2343_v24 }
0x12e4   :  { %2694 = vrot.lane.b32.xlu1 %v2360_v43, %s4898_s13 }
0x12f1   :  { %v2524_v29 = vpop.permute.xlu1 %2523 }
0x12f2   :  { %v2526_v51 = vmul.f32 %v2524_v29, %v2509_v9 }
0x12f4   :  { %2860 = vrot.lane.b32.xlu0 %v2526_v51, %s4898_s13 }
0x12f9   :  { %v2690_v48 = vpop.permute.xlu0 %2689 }
0x12fa   :  { %v5411_v41 = vmul.f32 %v2690_v48, %v2675_v15 }
0x12fc   :  { %3026 = vrot.lane.b32.xlu1 %v5411_v41, %s4898_s13 }
0x1356   :  { %v2695_v36 = vpop.permute.xlu1 %2694 }
0x1357   :  { %4347 = vmatmul.mubr.msk.f32.vlgmr.msra.gmra.mrb[24].mxu1 %vm49_vm0, %v2695_v36  ;;  %4358 = vmatmul.mubr.msk.f32.vlgmr.msra.gmra.mrb[20].mxu0 %vm49_vm0, %v2695_v36  ;;  %v4866_v36 = vld [vmem:[%s5590_s2 + $0x2] ss:$0 sm:$0xff] }
0x1358   :  { %4655 = vmatpush3.bf16.msra.mxu0 %v5016_v52  ;;  %4661 = vmatpush3.bf16.msra.mxu1 %v5062_v32 }
0x1359   :  { %4656 = vmatprep.subr.bf16.mxu0 %v4894_v13  ;;  %4662 = vmatprep.subr.bf16.mxu1 %v4894_v13 }
0x135a   :  { %4368 = vmatprep.mubr.msk.f32.mxu0 %vm4895_vm1, %v4896_v19  ;;  %4379 = vmatprep.mubr.msk.f32.mxu1 %vm4895_vm1, %v4896_v19 }
0x135c   :  { %4658 = vmatpush3.bf16.msra.mxu0 %v5021_v56  ;;  %4664 = vmatpush3.bf16.msra.mxu1 %v5066_v35 }
0x135d   :  { %4665 = vmatprep.subr.bf16.mxu1 %v4894_v13  ;;  %4671 = vmatprep.subr.bf16.mxu0 %v4894_v13 }
0x1366   :  { %v2861_v55 = vpop.permute.xlu0 %2860 }
0x1367   :  { %4369 = vmatmul.mubr.msk.f32.vlgmr.msra.gmra.mrb[20].mxu0 %vm49_vm0, %v2861_v55  ;;  %4380 = vmatmul.mubr.msk.f32.vlgmr.msra.gmra.mrb[26].mxu1 %vm49_vm0, %v2861_v55 }
0x1368   :  { %4667 = vmatpush3.bf16.msra.mxu1 %v5078_v44  ;;  %4390 = vmatprep.mubr.msk.f32.mxu1 %vm4895_vm1, %v4896_v19 }
0x1369   :  { %4668 = vmatprep.subr.bf16.mxu1 %v4894_v13  ;;  %4673 = vmatpush3.bf16.msra.mxu0 %v4999_v42  ;;  %v176_v42 = vadd.f32 %v5382_v11, %v4986_v25 }
0x136a   :  { %4674 = vmatprep.subr.bf16.mxu0 %v4894_v13  ;;  %4401 = vmatprep.mubr.msk.f32.mxu0 %vm4895_vm1, %v4896_v19 }
0x136c   :  { %4670 = vmatpush3.bf16.msra.mxu1 %v5085_v49 }
0x136d   :  { %4676 = vmatpush3.bf16.msra.mxu0 %v5007_v46  ;;  %4683 = vmatprep.subr.bf16.mxu1 %v4894_v13 }
0x136e   :  { %v3027_v60 = vpop.permute.xlu1 %3026  ;;  %4677 = vmatprep.subr.bf16.mxu0 %v4894_v13 }
0x136f   :  { %4391 = vmatmul.mubr.msk.f32.vlgmr.msra.gmra.mrb[26].mxu1 %vm49_vm0, %v3027_v60 }
0x1370   :  { %4685 = vmatpush3.bf16.msra.mxu1 %v5062_v32  ;;  %4423 = vmatprep.mubr.msk.f32.mxu1 %vm4895_vm1, %v4896_v19 }
0x1371   :  { %4686 = vmatprep.subr.bf16.mxu1 %v4894_v13 }
0x1374   :  { %4688 = vmatpush3.bf16.msra.mxu1 %v5066_v35 }
0x1375   :  { %4689 = vmatprep.subr.bf16.mxu1 %v4894_v13 }
0x142a   :  { %v2764_v46 = vpop.f32.mrb[24].mxu1 }
0x142b   :  { %v2768_v61 = vadd.f32 %v2764_v46, %v176_v42  ;;  %v4348_v18 = vpop.f32.mrb[25].mxu1 }
0x142d   :  { %4840 = vtanh.f32 %v2768_v61 }
0x1437   :  { %v4841_v62 = vpop.eup %4840 }
0x1438   :  { %2774 = vrot.lane.b32.xlu0 %v4841_v62, %s4897_s12  ;;  %v2770_v5 = vmul.f32 0.5, %v4841_v62 }
0x143a   :  { %v2930_v0 = vpop.f32.mrb[20].mxu0  ;;  %v2771_v22 = vadd.f32 0.5, %v2770_v5 }
0x143b   :  { %v4722_v58 = vadd.f32 %v5456_v1, %v2930_v0  ;;  %v4370_v2 = vpop.f32.mrb[21].mxu0 }
0x143c   :  { %v2772_v12 = vmul.f32 %v2771_v22, %v5395_v30 }
0x143d   :  { %4842 = vtanh.f32 %v4722_v58 }
0x1442   :  { %v3096_v3 = vpop.f32.mrb[26].mxu1 }
0x1443   :  { %v4723_v25 = vadd.f32 %v5117_v59, %v3096_v3  ;;  %v4392_v11 = vpop.f32.mrb[27].mxu1 }
0x1445   :  { %4844 = vtanh.f32 %v4723_v25 }
0x1447   :  { %v4843_v4 = vpop.eup %4842 }
0x1448   :  { %2940 = vrot.lane.b32.xlu1 %v4843_v4, %s4897_s12  ;;  %v2936_v20 = vmul.f32 0.5, %v4843_v4 }
0x144a   :  { %v2937_v24 = vadd.f32 0.5, %v2936_v20 }
0x144c   :  { %v2938_v21 = vmul.f32 %v2937_v24, %v5400_v26 }
0x144f   :  { %v4845_v57 = vpop.eup %4844 }
0x1450   :  { %3106 = vrot.lane.b32.xlu0 %v4845_v57, %s4897_s12  ;;  %v3102_v59 = vmul.f32 0.5, %v4845_v57 }
0x1452   :  { %v3103_v63 = vadd.f32 0.5, %v3102_v59 }
0x1454   :  { %v3104_v33 = vmul.f32 %v3103_v63, %v5404_v34 }
0x14aa   :  { %v2775_v6 = vpop.permute.xlu0 %2774 }
0x14ab   :  { %v2777_v27 = vmul.f32 %v2775_v6, %v2771_v22 }
0x14ad   :  { %2779 = vrot.lane.b32.xlu1 %v2777_v27, %s4898_s13 }
0x14ba   :  { %v2941_v7 = vpop.permute.xlu1 %2940 }
0x14bb   :  { %v2943_v8 = vmul.f32 %v2941_v7, %v2937_v24 }
0x14bd   :  { %2945 = vrot.lane.b32.xlu0 %v2943_v8, %s4898_s13 }
0x14c2   :  { %v3107_v9 = vpop.permute.xlu0 %3106 }
0x14c3   :  { %v3109_v10 = vmul.f32 %v3107_v9, %v3103_v63 }
0x14c5   :  { %3111 = vrot.lane.b32.xlu1 %v3109_v10, %s4898_s13 }
0x151f   :  { %v2780_v14 = vpop.permute.xlu1 %2779 }
0x1520   :  { %v2782_v15 = vadd.f32 %v2780_v14, %v2772_v12 }
0x1522   :  { %4846 = vtanh.f32 %v2782_v15 }
0x152c   :  { %v4847_v16 = vpop.eup %4846 }
0x152d   :  { %2785 = vrot.lane.b32.xlu0 %v4847_v16, %s4897_s12 }
0x152f   :  { %v2946_v23 = vpop.permute.xlu0 %2945 }
0x1530   :  { %v5468_v28 = vadd.f32 %v2946_v23, %v2938_v21 }
0x1532   :  { %4848 = vtanh.f32 %v5468_v28 }
0x1537   :  { %v3112_v39 = vpop.permute.xlu1 %3111 }
0x1538   :  { %v5472_v40 = vadd.f32 %v3112_v39, %v3104_v33 }
0x153a   :  { %4850 = vtanh.f32 %v5472_v40 }
0x153c   :  { %v4849_v30 = vpop.eup %4848 }
0x153d   :  { %2951 = vrot.lane.b32.xlu1 %v4849_v30, %s4897_s12 }
0x1544   :  { %v4851_v31 = vpop.eup %4850 }
0x1545   :  { %3117 = vrot.lane.b32.xlu0 %v4851_v31, %s4897_s12 }
0x159f   :  { %v2786_v45 = vpop.permute.xlu0 %2785 }
0x15a0   :  { %v2788_v26 = vmul.f32 %v2786_v45, %v2771_v22 }
0x15a2   :  { %3122 = vrot.lane.b32.xlu1 %v2788_v26, %s4898_s13 }
0x15af   :  { %v2952_v37 = vpop.permute.xlu1 %2951 }
0x15b0   :  { %v2954_v17 = vmul.f32 %v2952_v37, %v2937_v24 }
0x15b2   :  { %3197 = vrot.lane.b32.xlu0 %v2954_v17, %s4898_s13 }
0x15b7   :  { %v3118_v34 = vpop.permute.xlu0 %3117 }
0x15b8   :  { %v5479_v38 = vmul.f32 %v3118_v34, %v3103_v63 }
0x15ba   :  { %3363 = vrot.lane.b32.xlu1 %v5479_v38, %s4898_s13 }
0x1614   :  { %v3123_v43 = vpop.permute.xlu1 %3122 }
0x1615   :  { %4402 = vmatmul.mubr.msk.f32.vlgmr.msra.gmra.mrb[22].mxu0 %vm49_vm0, %v3123_v43 }
0x1616   :  { %4679 = vmatpush3.bf16.msra.mxu0 %v5016_v52  ;;  %4412 = vmatprep.mubr.msk.f32.mxu0 %vm4895_vm1, %v4896_v19 }
0x1617   :  { %4680 = vmatprep.subr.bf16.mxu0 %v4894_v13 }
0x161a   :  { %4682 = vmatpush3.bf16.msra.mxu0 %v5021_v56 }
0x161b   :  { %4695 = vmatprep.subr.bf16.mxu0 %v4894_v13 }
0x1624   :  { %v3198_v29 = vpop.permute.xlu0 %3197 }
0x1625   :  { %4413 = vmatmul.mubr.msk.f32.vlgmr.msra.gmra.mrb[22].mxu0 %vm49_vm0, %v3198_v29  ;;  %4424 = vmatmul.mubr.msk.f32.vlgmr.msra.gmra.mrb[28].mxu1 %vm49_vm0, %v3198_v29 }
0x1626   :  { %4691 = vmatpush3.bf16.msra.mxu1 %v5078_v44  ;;  %4434 = vmatprep.mubr.msk.f32.mxu1 %vm4895_vm1, %v4896_v19 }
0x1627   :  { %4692 = vmatprep.subr.bf16.mxu1 %v4894_v13  ;;  %4697 = vmatpush3.bf16.msra.mxu0 %v5062_v32 }
0x1628   :  { %4698 = vmatprep.subr.bf16.mxu0 %v4894_v13  ;;  %4445 = vmatprep.mubr.msk.f32.mxu0 %vm4895_vm1, %v4896_v19 }
0x162a   :  { %4694 = vmatpush3.bf16.msra.mxu1 %v5085_v49 }
0x162b   :  { %4700 = vmatpush3.bf16.msra.mxu0 %v5066_v35 }
0x162c   :  { %v3364_v52 = vpop.permute.xlu1 %3363  ;;  %4701 = vmatprep.subr.bf16.mxu0 %v4894_v13 }
0x162d   :  { %4435 = vmatmul.mubr.msk.f32.vlgmr.msra.gmra.mrb[28].mxu1 %vm49_vm0, %v3364_v52 }
0x16f8   :  { %v3267_v56 = vpop.f32.mrb[22].mxu0 }
0x16f9   :  { %v4724_v51 = vadd.f32 %v5456_v1, %v3267_v56  ;;  %v4414_v48 = vpop.f32.mrb[23].mxu0 }
0x16fb   :  { %4852 = vtanh.f32 %v4724_v51 }
0x1700   :  { %v3433_v32 = vpop.f32.mrb[28].mxu1 }
0x1701   :  { %v4725_v55 = vadd.f32 %v4866_v36, %v3433_v32  ;;  %v4436_v60 = vpop.f32.mrb[29].mxu1 }
0x1703   :  { %4854 = vtanh.f32 %v4725_v55 }
0x1705   :  { %v4853_v42 = vpop.eup %4852 }
0x1706   :  { %3277 = vrot.lane.b32.xlu0 %v4853_v42, %s4897_s12  ;;  %v3273_v46 = vmul.f32 0.5, %v4853_v42  ;;  %v3786_v42 = vld [vmem:[%s5590_s2 + $0x4] ss:$0 sm:$0xff] }
0x1708   :  { %v3274_v61 = vadd.f32 0.5, %v3273_v46 }
0x170a   :  { %v3275_v3 = vmul.f32 %v3274_v61, %v5468_v28 }
0x170d   :  { %v4855_v35 = vpop.eup %4854 }
0x170e   :  { %3443 = vrot.lane.b32.xlu1 %v4855_v35, %s4897_s12  ;;  %v3439_v0 = vmul.f32 0.5, %v4855_v35 }
0x1710   :  { %v3440_v1 = vadd.f32 0.5, %v3439_v0 }
0x1712   :  { %v3441_v4 = vmul.f32 %v3440_v1, %v5472_v40 }
0x1778   :  { %v3278_v18 = vpop.permute.xlu0 %3277 }
0x1779   :  { %v3280_v62 = vmul.f32 %v3278_v18, %v3274_v61 }
0x177b   :  { %3282 = vrot.lane.b32.xlu0 %v3280_v62, %s4898_s13 }
0x1780   :  { %v3444_v58 = vpop.permute.xlu1 %3443 }
0x1781   :  { %v3446_v2 = vmul.f32 %v3444_v58, %v3440_v1 }
0x1783   :  { %3448 = vrot.lane.b32.xlu1 %v3446_v2, %s4898_s13 }
0x17ed   :  { %v3283_v25 = vpop.permute.xlu0 %3282 }
0x17ee   :  { %v3285_v11 = vadd.f32 %v3283_v25, %v3275_v3 }
0x17f0   :  { %4856 = vtanh.f32 %v3285_v11 }
0x17f5   :  { %v3449_v57 = vpop.permute.xlu1 %3448 }
0x17f6   :  { %v3451_v5 = vadd.f32 %v3449_v57, %v3441_v4 }
0x17f8   :  { %4858 = vtanh.f32 %v3451_v5 }
0x17fa   :  { %v4857_v22 = vpop.eup %4856 }
0x17fb   :  { %3288 = vrot.lane.b32.xlu0 %v4857_v22, %s4897_s12 }
0x1802   :  { %v4859_v6 = vpop.eup %4858 }
0x1803   :  { %3454 = vrot.lane.b32.xlu1 %v4859_v6, %s4897_s12 }
0x186d   :  { %v3289_v27 = vpop.permute.xlu0 %3288 }
0x186e   :  { %v3291_v20 = vmul.f32 %v3289_v27, %v3274_v61 }
0x1870   :  { %3459 = vrot.lane.b32.xlu0 %v3291_v20, %s4898_s13 }
0x1875   :  { %v3455_v24 = vpop.permute.xlu1 %3454 }
0x1876   :  { %v3457_v7 = vmul.f32 %v3455_v24, %v3440_v1 }
0x1878   :  { %3534 = vrot.lane.b32.xlu1 %v3457_v7, %s4898_s13 }
0x18e2   :  { %v3460_v8 = vpop.permute.xlu0 %3459 }
0x18e3   :  { %4446 = vmatmul.mubr.msk.f32.vlgmr.msra.gmra.mrb[24].mxu0 %vm49_vm0, %v3460_v8 }
0x18e4   :  { %4703 = vmatpush3.bf16.msra.mxu0 %v5078_v44  ;;  %4456 = vmatprep.mubr.msk.f32.mxu0 %vm4895_vm1, %v4896_v19 }
0x18e5   :  { %4704 = vmatprep.subr.bf16.mxu0 %v4894_v13  ;;  %v3785_v13 = vld [vmem:[%s5590_s2 + $0x3] ss:$0 sm:$0xff] }
0x18e8   :  { %4706 = vmatpush3.bf16.msra.mxu0 %v5085_v49 }
0x18ea   :  { %v3535_v59 = vpop.permute.xlu1 %3534 }
0x18eb   :  { %4457 = vmatmul.mubr.msk.f32.vlgmr.msra.gmra.mrb[24].mxu0 %vm49_vm0, %v3535_v59 }
0x19be   :  { %v3604_v63 = vpop.f32.mrb[24].mxu0 }
0x19bf   :  { %v4726_v9 = vadd.f32 %v4866_v36, %v3604_v63  ;;  %v4458_v10 = vpop.f32.mrb[25].mxu0 }
0x19c1   :  { %4860 = vtanh.f32 %v4726_v9 }
0x19cb   :  { %v4861_v12 = vpop.eup %4860 }
0x19cc   :  { %3614 = vrot.lane.b32.xlu0 %v4861_v12, %s4897_s12  ;;  %v3610_v14 = vmul.f32 0.5, %v4861_v12 }
0x19ce   :  { %v3611_v15 = vadd.f32 0.5, %v3610_v14 }
0x19d0   :  { %v3612_v19 = vmul.f32 %v3611_v15, %v3451_v5 }
0x1a3e   :  { %v3615_v44 = vpop.permute.xlu0 %3614 }
0x1a3f   :  { %v3617_v16 = vmul.f32 %v3615_v44, %v3611_v15 }
0x1a41   :  { %3619 = vrot.lane.b32.xlu1 %v3617_v16, %s4898_s13 }
0x1a45   :  { %3636 = vrot.lane.b32.xlu1 %v3785_v13, %s4899_s29 }
0x1ab3   :  { %v3620_v49 = vpop.permute.xlu1 %3619 }
0x1ab4   :  { %v3622_v21 = vadd.f32 %v3620_v49, %v3612_v19 }
0x1ab6   :  { %4862 = vtanh.f32 %v3622_v21 }
0x1ab7   :  { %v3637_v23 = vpop.permute.xlu1 %3636 }
0x1ab8   :  { %v3640_v28 = vmul.f32 %v3637_v23, %v5208_v50  ;;  %v3642_v33 = vmul.f32 %v3637_v23, %v5340_v54  ;;  %v3644_v40 = vmul.f32 %v3637_v23, %v5479_v38  ;;  %v3639_v30 = vmul.f32 %v3637_v23, %v5141_v47 }
0x1ab9   :  { %v3641_v31 = vmul.f32 %v3637_v23, %v5274_v53  ;;  %v3643_v50 = vmul.f32 %v3637_v23, %v5411_v41  ;;  %v3645_v54 = vmul.f32 %v3637_v23, %v3457_v7 }
0x1aba   :  { %3657 = vrot.lane.b32.xlu1 %v3640_v28, %s4898_s13 }
0x1abe   :  { %3661 = vrot.lane.b32.xlu1 %v3642_v33, %s4898_s13 }
0x1ac0   :  { %v4863_v39 = vpop.eup %4862 }
0x1ac1   :  { %3625 = vrot.lane.b32.xlu0 %v4863_v39, %s4897_s12 }
0x1ac2   :  { %3665 = vrot.lane.b32.xlu1 %v3644_v40, %s4898_s13 }
0x1ac5   :  { %3655 = vrot.lane.b32.xlu0 %v3639_v30, %s4898_s13 }
0x1ac9   :  { %3659 = vrot.lane.b32.xlu0 %v3641_v31, %s4898_s13 }
0x1acd   :  { %3663 = vrot.lane.b32.xlu0 %v3643_v50, %s4898_s13 }
0x1ad1   :  { %3667 = vrot.lane.b32.xlu0 %v3645_v54, %s4898_s13 }
0x1b2c   :  { %v3658_v37 = vpop.permute.xlu1 %3657 }
0x1b2d   :  { %v3682_v51 = vsel %vm49_vm0, %v3658_v37, 0.0 }
0x1b30   :  { %v3662_v53 = vpop.permute.xlu1 %3661 }
0x1b31   :  { %v3688_v41 = vsel %vm49_vm0, %v3662_v53, 0.0 }
0x1b33   :  { %v3626_v45 = vpop.permute.xlu0 %3625 }
0x1b34   :  { %v3628_v26 = vmul.f32 %v3626_v45, %v3611_v15  ;;  %v3666_v29 = vpop.permute.xlu1 %3665 }
0x1b35   :  { %v3694_v52 = vsel %vm49_vm0, %v3666_v29, 0.0 }
0x1b36   :  { %v3646_v17 = vmul.f32 %v3637_v23, %v3628_v26 }
0x1b37   :  { %v3656_v34 = vpop.permute.xlu0 %3655 }
0x1b38   :  { %v3679_v47 = vsel %vm49_vm0, %v3656_v34, 0.0  ;;  %3669 = vrot.lane.b32.xlu1 %v3646_v17, %s4898_s13 }
0x1b39   :  { %3680 = vadd.xlane.f32.xlu0 %v3679_v47 }
0x1b3b   :  { %v3660_v38 = vpop.permute.xlu0 %3659 }
0x1b3c   :  { %v3685_v43 = vsel %vm49_vm0, %v3660_v38, 0.0 }
0x1b3d   :  { %3686 = vadd.xlane.f32.xlu0 %v3685_v43 }
0x1b3f   :  { %v3664_v56 = vpop.permute.xlu0 %3663 }
0x1b40   :  { %v3691_v48 = vsel %vm49_vm0, %v3664_v56, 0.0 }
0x1b41   :  { %3689 = vadd.xlane.f32.xlu0 %v3688_v41 }
0x1b43   :  { %v3668_v32 = vpop.permute.xlu0 %3667 }
0x1b44   :  { %v3697_v36 = vsel %vm49_vm0, %v3668_v32, 0.0 }
0x1b45   :  { %3695 = vadd.xlane.f32.xlu0 %v3694_v52 }
0x1b5c   :  { %3683 = vadd.xlane.f32.xlu1 %v3682_v51 }
0x1b60   :  { %3692 = vadd.xlane.f32.xlu1 %v3691_v48 }
0x1b64   :  { %3698 = vadd.xlane.f32.xlu1 %v3697_v36 }
0x1baa   :  { %v3670_v55 = vpop.permute.xlu1 %3669 }
0x1bab   :  { %v3700_v60 = vsel %vm49_vm0, %v3670_v55, 0.0 }
0x1bac   :  { %3701 = vadd.xlane.f32.xlu0 %v3700_v60 }
0x1bc6   :  { %v3681_v35 = vpop.xlane.xlu0 %3680 }
0x1bc7   :  { %v3707_v46 = vadd.f32 %v3786_v42, %v3681_v35 }
0x1bc9   :  { %v3715_v61 = vmax.f32 %v3707_v46, 0.0 }
0x1bca   :  { %v3687_v18 = vpop.xlane.xlu0 %3686 }
0x1bcb   :  { %3724 = vst.msk [vmem:[%s5591_s3] sm:$0xff] %vm3723_vm2, %v3715_v61  ;;  %v3709_v62 = vadd.f32 %v3786_v42, %v3687_v18 }
0x1bcd   :  { %v3717_v0 = vmax.f32 %v3709_v62, 0.0 }
0x1bce   :  { %v3690_v1 = vpop.xlane.xlu0 %3689 }
0x1bcf   :  { %3726 = vst.msk [vmem:[%s5591_s3 + $0x10] sm:$0xff] %vm3723_vm2, %v3717_v0  ;;  %v3710_v58 = vadd.f32 %v3786_v42, %v3690_v1 }
0x1bd1   :  { %v3718_v2 = vmax.f32 %v3710_v58, 0.0 }
0x1bd2   :  { %v3696_v3 = vpop.xlane.xlu0 %3695 }
0x1bd3   :  { %3727 = vst.msk [vmem:[%s5591_s3 + $0x18] sm:$0xff] %vm3723_vm2, %v3718_v2  ;;  %v3712_v25 = vadd.f32 %v3786_v42, %v3696_v3 }
0x1bd5   :  { %v3720_v11 = vmax.f32 %v3712_v25, 0.0 }
0x1bd7   :  { %3729 = vst.msk [vmem:[%s5591_s3 + $0x28] sm:$0xff] %vm3723_vm2, %v3720_v11 }
0x1be9   :  { %v3684_v4 = vpop.xlane.xlu1 %3683 }
0x1bea   :  { %v3708_v57 = vadd.f32 %v3786_v42, %v3684_v4 }
0x1bec   :  { %v3716_v5 = vmax.f32 %v3708_v57, 0.0 }
0x1bed   :  { %v3693_v22 = vpop.xlane.xlu1 %3692 }
0x1bee   :  { %3725 = vst.msk [vmem:[%s5591_s3 + $0x8] sm:$0xff] %vm3723_vm2, %v3716_v5  ;;  %v3711_v6 = vadd.f32 %v3786_v42, %v3693_v22 }
0x1bf0   :  { %v3719_v27 = vmax.f32 %v3711_v6, 0.0 }
0x1bf1   :  { %v3699_v20 = vpop.xlane.xlu1 %3698 }
0x1bf2   :  { %3728 = vst.msk [vmem:[%s5591_s3 + $0x20] sm:$0xff] %vm3723_vm2, %v3719_v27  ;;  %v3713_v24 = vadd.f32 %v3786_v42, %v3699_v20 }
0x1bf4   :  { %v3721_v7 = vmax.f32 %v3713_v24, 0.0 }
0x1bf6   :  { %3730 = vst.msk [vmem:[%s5591_s3 + $0x30] sm:$0xff] %vm3723_vm2, %v3721_v7 }
0x1c39   :  { %v3702_v8 = vpop.xlane.xlu0 %3701 }
0x1c3a   :  { %v3714_v59 = vadd.f32 %v3786_v42, %v3702_v8 }
0x1c3c   :  { %v3722_v63 = vmax.f32 %v3714_v59, 0.0 }
0x1c3e   :  { %3731 = vst.msk [vmem:[%s5591_s3 + $0x38] sm:$0xff] %vm3723_vm2, %v3722_v63 }
0x1c3f   :  { %3736 = vsyncpa [#allocation3], 1 }

</bundles_post_ra>
